<compile_context>
chip_gen: v5e
topology: v5e:2x2
jax: 0.10.0
libtpu: 0.0.40
codegen_flags: <defaults>
</compile_context>

<pallas_src>
import functools

import jax
import jax.numpy as jnp
from jax import lax
from jax.experimental import pallas as pl
from jax.experimental.pallas import tpu as pltpu


# --- Pallas kernel ----------------------------------------------------------
def _conv_bn_lrelu_kernel(x_ref, w_ref, sb_ref, o_ref, *, K, stride, slope, Ho, Wo):
    """One grid step = one image.

    x_ref : (1, Hp, Wp, Cin)   padded NHWC input tile (VMEM)
    w_ref : (K*K*Cin, Cout)    conv weights, tap-major (VMEM, resident)
    sb_ref: (2, Cout)          row 0 = BN scale, row 1 = BN bias (VMEM, resident)
    o_ref : (1, Ho, Wo, Cout)  NHWC output tile
    """
    Cin = x_ref.shape[-1]
    Cout = o_ref.shape[-1]

    acc = jnp.zeros((Ho * Wo, Cout), jnp.float32)

    # Static K*K unrolled tap loop: each tap is one MXU matmul.
    for kh in range(K):
        for kw in range(K):
            if stride == 1:
                patch = x_ref[0, pl.ds(kh, Ho), pl.ds(kw, Wo), :]
            else:
                patch = x_ref[0, pl.ds(kh, Ho, stride), pl.ds(kw, Wo, stride), :]
            patch2 = patch.reshape(Ho * Wo, Cin)
            wk = w_ref[pl.ds((kh * K + kw) * Cin, Cin), :]        # (Cin, Cout)
            acc = acc + jnp.dot(patch2, wk, preferred_element_type=jnp.float32)

    # Folded BatchNorm (eval) epilogue: y = acc * scale + bias, then LeakyReLU.
    scale = sb_ref[0:1, :]                                        # (1, Cout)
    bias = sb_ref[1:2, :]                                         # (1, Cout)
    y = acc * scale + bias
    y = jnp.where(y > 0, y, y * slope)

    o_ref[0] = y.reshape(Ho, Wo, Cout).astype(o_ref.dtype)


# --- Wrapper ----------------------------------------------------------------
def conv_layer_forward(x, weight, gamma, beta, running_mean, running_var, *,
                       eps=1e-5, stride=1, slope=0.1):
    """x: NCHW (B, Cin, H, W); weight: OIHW (Cout, Cin, K, K). Returns NCHW."""
    B, Cin, H, W = x.shape
    Cout, Cin2, K, K2 = weight.shape
    assert Cin == Cin2 and K == K2
    pad = (K - 1) // 2

    # Fold BatchNorm (inference) into per-channel scale / bias.
    scale = gamma.astype(jnp.float32) / jnp.sqrt(running_var.astype(jnp.float32) + eps)
    bias = beta.astype(jnp.float32) - running_mean.astype(jnp.float32) * scale
    sb = jnp.stack([scale, bias], axis=0)                          # (2, Cout)

    # Layout glue: NCHW -> NHWC (channels on lanes) + spatial padding.
    x_nhwc = jnp.transpose(x, (0, 2, 3, 1)).astype(jnp.float32)
    x_pad = jnp.pad(x_nhwc, ((0, 0), (pad, pad), (pad, pad), (0, 0)))
    Hp, Wp = H + 2 * pad, W + 2 * pad
    Ho = (Hp - K) // stride + 1
    Wo = (Wp - K) // stride + 1

    # (Cout, Cin, K, K) -> (K, K, Cin, Cout) -> (K*K*Cin, Cout): each (kh, kw) tap
    # is a contiguous (Cin, Cout) slab for the MXU.
    w2 = jnp.transpose(weight, (2, 3, 1, 0)).reshape(K * K * Cin, Cout).astype(jnp.float32)

    kernel = functools.partial(_conv_bn_lrelu_kernel, K=K, stride=stride,
                               slope=float(slope), Ho=Ho, Wo=Wo)

    out_nhwc = pl.pallas_call(
        kernel,
        out_shape=jax.ShapeDtypeStruct((B, Ho, Wo, Cout), jnp.float32),
        grid=(B,),
        in_specs=[
            pl.BlockSpec((1, Hp, Wp, Cin), lambda b: (b, 0, 0, 0)),
            pl.BlockSpec((K * K * Cin, Cout), lambda b: (0, 0)),   # resident weights
            pl.BlockSpec((2, Cout), lambda b: (0, 0)),             # resident scale/bias
        ],
        out_specs=pl.BlockSpec((1, Ho, Wo, Cout), lambda b: (b, 0, 0, 0)),
        compiler_params=pltpu.CompilerParams(
            dimension_semantics=("parallel",)),
    )(x_pad, w2, sb)

    # Glue back to PyTorch's NCHW output layout.
    return jnp.transpose(out_nhwc, (0, 3, 1, 2))


# --- Pure-JAX reference (mirrors the PyTorch forward, eval-mode BN) ----------
def conv_layer_reference(x, weight, gamma, beta, running_mean, running_var, *,
                         eps=1e-5, stride=1, slope=0.1):
    pad = (weight.shape[-1] - 1) // 2
    y = lax.conv_general_dilated(
        x.astype(jnp.float32), weight.astype(jnp.float32),
        window_strides=(stride, stride),
        padding=((pad, pad), (pad, pad)),
        dimension_numbers=("NCHW", "OIHW", "NCHW"),
        precision=lax.Precision.HIGHEST)
    sc = gamma / jnp.sqrt(running_var + eps)
    bs = beta - running_mean * sc
    y = y * sc[None, :, None, None] + bs[None, :, None, None]
    return jnp.where(y > 0, y, slope * y)


if __name__ == "__main__":
    B, Cin, H, W = 2, 16, 16, 16
    Cout, K, stride, slope = 128, 3, 1, 0.1     # Cout=128 -> lane-dense output
    eps = 1e-5

    key = jax.random.PRNGKey(0)
    k1, k2, k3, k4, k5, k6 = jax.random.split(key, 6)
    x = jax.random.normal(k1, (B, Cin, H, W), dtype=jnp.float32) * 0.5
    w = jax.random.normal(k2, (Cout, Cin, K, K), dtype=jnp.float32) * 0.1
    gamma = 1.0 + 0.1 * jax.random.normal(k3, (Cout,), dtype=jnp.float32)
    beta = 0.1 * jax.random.normal(k4, (Cout,), dtype=jnp.float32)
    r_mean = 0.1 * jax.random.normal(k5, (Cout,), dtype=jnp.float32)
    r_var = jax.random.uniform(k6, (Cout,), dtype=jnp.float32, minval=0.5, maxval=1.5)

    out = conv_layer_forward(x, w, gamma, beta, r_mean, r_var,
                             eps=eps, stride=stride, slope=slope)
    out = jax.block_until_ready(out)

    ref = conv_layer_reference(x, w, gamma, beta, r_mean, r_var,
                               eps=eps, stride=stride, slope=slope)
    assert out.shape == (B, Cout, H, W), out.shape
    # Tolerance accounts for MXU bf16-pass accumulation vs HIGHEST-precision reference.
    assert jnp.allclose(out, ref, rtol=1e-2, atol=1e-2), float(jnp.max(jnp.abs(out - ref)))

    print("KERNEL_OK")
</pallas_src>

<mosaic_0001>
module attributes {stable_mosaic.version = 11 : i64} {
  func.func @_conv_bn_lrelu_kernel(%arg0: i32, %arg1: memref<1x18x18x16xf32, #tpu.memory_space<vmem>>, %arg2: memref<144x128xf32, #tpu.memory_space<vmem>>, %arg3: memref<2x128xf32, #tpu.memory_space<vmem>>, %arg4: memref<1x16x16x128xf32, #tpu.memory_space<vmem>>) attributes {dimension_semantics = [#tpu.dimension_semantics<parallel>], iteration_bounds = array<i64: 2>, scalar_prefetch = 0 : i64, scratch_operands = 0 : i64, tpu.core_type = #tpu.core_type<tc>, window_params = [{transform_indices = @transform_0, window_bounds = array<i64: 1, 18, 18, 16>}, {pipeline_mode = #tpu.pipeline_mode<synchronous>, transform_indices = @transform_1, window_bounds = array<i64: 144, 128>}, {pipeline_mode = #tpu.pipeline_mode<synchronous>, transform_indices = @transform_2, window_bounds = array<i64: 2, 128>}, {transform_indices = @transform_3, window_bounds = array<i64: 1, 16, 16, 128>}]} {
    %cst = arith.constant 0.000000e+00 : f32
    %0 = vector.broadcast %cst : f32 to vector<256x128xf32>
    %c0 = arith.constant 0 : index
    %c0_0 = arith.constant 0 : index
    %c0_1 = arith.constant 0 : index
    %c0_2 = arith.constant 0 : index
    %1 = vector.load %arg1[%c0, %c0_0, %c0_1, %c0_2] : memref<1x18x18x16xf32, #tpu.memory_space<vmem>>, vector<1x16x16x16xf32>
    %2 = vector.shape_cast %1 : vector<1x16x16x16xf32> to vector<16x16x16xf32>
    %3 = vector.shape_cast %2 : vector<16x16x16xf32> to vector<256x16xf32>
    %c0_3 = arith.constant 0 : index
    %c0_4 = arith.constant 0 : index
    %4 = vector.load %arg2[%c0_3, %c0_4] : memref<144x128xf32, #tpu.memory_space<vmem>>, vector<16x128xf32>
    %cst_5 = arith.constant dense<0.000000e+00> : vector<256x128xf32>
    %5 = tpu.matmul %3, %4, %cst_5 {dimension_numbers = #tpu.dot_dimension_numbers<[1], [0], [0], [1], [0, 0, 1, 1], [], []>} : vector<256x16xf32>, vector<16x128xf32>, vector<256x128xf32> -> vector<256x128xf32>
    %6 = arith.addf %0, %5 : vector<256x128xf32>
    %c0_6 = arith.constant 0 : index
    %c0_7 = arith.constant 0 : index
    %c1 = arith.constant 1 : index
    %c0_8 = arith.constant 0 : index
    %7 = vector.load %arg1[%c0_6, %c0_7, %c1, %c0_8] : memref<1x18x18x16xf32, #tpu.memory_space<vmem>>, vector<1x16x16x16xf32>
    %8 = vector.shape_cast %7 : vector<1x16x16x16xf32> to vector<16x16x16xf32>
    %9 = vector.shape_cast %8 : vector<16x16x16xf32> to vector<256x16xf32>
    %c16 = arith.constant 16 : index
    %c0_9 = arith.constant 0 : index
    %10 = vector.load %arg2[%c16, %c0_9] : memref<144x128xf32, #tpu.memory_space<vmem>>, vector<16x128xf32>
    %cst_10 = arith.constant dense<0.000000e+00> : vector<256x128xf32>
    %11 = tpu.matmul %9, %10, %cst_10 {dimension_numbers = #tpu.dot_dimension_numbers<[1], [0], [0], [1], [0, 0, 1, 1], [], []>} : vector<256x16xf32>, vector<16x128xf32>, vector<256x128xf32> -> vector<256x128xf32>
    %12 = arith.addf %6, %11 : vector<256x128xf32>
    %c0_11 = arith.constant 0 : index
    %c0_12 = arith.constant 0 : index
    %c2 = arith.constant 2 : index
    %c0_13 = arith.constant 0 : index
    %13 = vector.load %arg1[%c0_11, %c0_12, %c2, %c0_13] : memref<1x18x18x16xf32, #tpu.memory_space<vmem>>, vector<1x16x16x16xf32>
    %14 = vector.shape_cast %13 : vector<1x16x16x16xf32> to vector<16x16x16xf32>
    %15 = vector.shape_cast %14 : vector<16x16x16xf32> to vector<256x16xf32>
    %c32 = arith.constant 32 : index
    %c0_14 = arith.constant 0 : index
    %16 = vector.load %arg2[%c32, %c0_14] : memref<144x128xf32, #tpu.memory_space<vmem>>, vector<16x128xf32>
    %cst_15 = arith.constant dense<0.000000e+00> : vector<256x128xf32>
    %17 = tpu.matmul %15, %16, %cst_15 {dimension_numbers = #tpu.dot_dimension_numbers<[1], [0], [0], [1], [0, 0, 1, 1], [], []>} : vector<256x16xf32>, vector<16x128xf32>, vector<256x128xf32> -> vector<256x128xf32>
    %18 = arith.addf %12, %17 : vector<256x128xf32>
    %c0_16 = arith.constant 0 : index
    %c1_17 = arith.constant 1 : index
    %c0_18 = arith.constant 0 : index
    %c0_19 = arith.constant 0 : index
    %19 = vector.load %arg1[%c0_16, %c1_17, %c0_18, %c0_19] : memref<1x18x18x16xf32, #tpu.memory_space<vmem>>, vector<1x16x16x16xf32>
    %20 = vector.shape_cast %19 : vector<1x16x16x16xf32> to vector<16x16x16xf32>
    %21 = vector.shape_cast %20 : vector<16x16x16xf32> to vector<256x16xf32>
    %c48 = arith.constant 48 : index
    %c0_20 = arith.constant 0 : index
    %22 = vector.load %arg2[%c48, %c0_20] : memref<144x128xf32, #tpu.memory_space<vmem>>, vector<16x128xf32>
    %cst_21 = arith.constant dense<0.000000e+00> : vector<256x128xf32>
    %23 = tpu.matmul %21, %22, %cst_21 {dimension_numbers = #tpu.dot_dimension_numbers<[1], [0], [0], [1], [0, 0, 1, 1], [], []>} : vector<256x16xf32>, vector<16x128xf32>, vector<256x128xf32> -> vector<256x128xf32>
    %24 = arith.addf %18, %23 : vector<256x128xf32>
    %c0_22 = arith.constant 0 : index
    %c1_23 = arith.constant 1 : index
    %c1_24 = arith.constant 1 : index
    %c0_25 = arith.constant 0 : index
    %25 = vector.load %arg1[%c0_22, %c1_23, %c1_24, %c0_25] : memref<1x18x18x16xf32, #tpu.memory_space<vmem>>, vector<1x16x16x16xf32>
    %26 = vector.shape_cast %25 : vector<1x16x16x16xf32> to vector<16x16x16xf32>
    %27 = vector.shape_cast %26 : vector<16x16x16xf32> to vector<256x16xf32>
    %c64 = arith.constant 64 : index
    %c0_26 = arith.constant 0 : index
    %28 = vector.load %arg2[%c64, %c0_26] : memref<144x128xf32, #tpu.memory_space<vmem>>, vector<16x128xf32>
    %cst_27 = arith.constant dense<0.000000e+00> : vector<256x128xf32>
    %29 = tpu.matmul %27, %28, %cst_27 {dimension_numbers = #tpu.dot_dimension_numbers<[1], [0], [0], [1], [0, 0, 1, 1], [], []>} : vector<256x16xf32>, vector<16x128xf32>, vector<256x128xf32> -> vector<256x128xf32>
    %30 = arith.addf %24, %29 : vector<256x128xf32>
    %c0_28 = arith.constant 0 : index
    %c1_29 = arith.constant 1 : index
    %c2_30 = arith.constant 2 : index
    %c0_31 = arith.constant 0 : index
    %31 = vector.load %arg1[%c0_28, %c1_29, %c2_30, %c0_31] : memref<1x18x18x16xf32, #tpu.memory_space<vmem>>, vector<1x16x16x16xf32>
    %32 = vector.shape_cast %31 : vector<1x16x16x16xf32> to vector<16x16x16xf32>
    %33 = vector.shape_cast %32 : vector<16x16x16xf32> to vector<256x16xf32>
    %c80 = arith.constant 80 : index
    %c0_32 = arith.constant 0 : index
    %34 = vector.load %arg2[%c80, %c0_32] : memref<144x128xf32, #tpu.memory_space<vmem>>, vector<16x128xf32>
    %cst_33 = arith.constant dense<0.000000e+00> : vector<256x128xf32>
    %35 = tpu.matmul %33, %34, %cst_33 {dimension_numbers = #tpu.dot_dimension_numbers<[1], [0], [0], [1], [0, 0, 1, 1], [], []>} : vector<256x16xf32>, vector<16x128xf32>, vector<256x128xf32> -> vector<256x128xf32>
    %36 = arith.addf %30, %35 : vector<256x128xf32>
    %c0_34 = arith.constant 0 : index
    %c2_35 = arith.constant 2 : index
    %c0_36 = arith.constant 0 : index
    %c0_37 = arith.constant 0 : index
    %37 = vector.load %arg1[%c0_34, %c2_35, %c0_36, %c0_37] : memref<1x18x18x16xf32, #tpu.memory_space<vmem>>, vector<1x16x16x16xf32>
    %38 = vector.shape_cast %37 : vector<1x16x16x16xf32> to vector<16x16x16xf32>
    %39 = vector.shape_cast %38 : vector<16x16x16xf32> to vector<256x16xf32>
    %c96 = arith.constant 96 : index
    %c0_38 = arith.constant 0 : index
    %40 = vector.load %arg2[%c96, %c0_38] : memref<144x128xf32, #tpu.memory_space<vmem>>, vector<16x128xf32>
    %cst_39 = arith.constant dense<0.000000e+00> : vector<256x128xf32>
    %41 = tpu.matmul %39, %40, %cst_39 {dimension_numbers = #tpu.dot_dimension_numbers<[1], [0], [0], [1], [0, 0, 1, 1], [], []>} : vector<256x16xf32>, vector<16x128xf32>, vector<256x128xf32> -> vector<256x128xf32>
    %42 = arith.addf %36, %41 : vector<256x128xf32>
    %c0_40 = arith.constant 0 : index
    %c2_41 = arith.constant 2 : index
    %c1_42 = arith.constant 1 : index
    %c0_43 = arith.constant 0 : index
    %43 = vector.load %arg1[%c0_40, %c2_41, %c1_42, %c0_43] : memref<1x18x18x16xf32, #tpu.memory_space<vmem>>, vector<1x16x16x16xf32>
    %44 = vector.shape_cast %43 : vector<1x16x16x16xf32> to vector<16x16x16xf32>
    %45 = vector.shape_cast %44 : vector<16x16x16xf32> to vector<256x16xf32>
    %c112 = arith.constant 112 : index
    %c0_44 = arith.constant 0 : index
    %46 = vector.load %arg2[%c112, %c0_44] : memref<144x128xf32, #tpu.memory_space<vmem>>, vector<16x128xf32>
    %cst_45 = arith.constant dense<0.000000e+00> : vector<256x128xf32>
    %47 = tpu.matmul %45, %46, %cst_45 {dimension_numbers = #tpu.dot_dimension_numbers<[1], [0], [0], [1], [0, 0, 1, 1], [], []>} : vector<256x16xf32>, vector<16x128xf32>, vector<256x128xf32> -> vector<256x128xf32>
    %48 = arith.addf %42, %47 : vector<256x128xf32>
    %c0_46 = arith.constant 0 : index
    %c2_47 = arith.constant 2 : index
    %c2_48 = arith.constant 2 : index
    %c0_49 = arith.constant 0 : index
    %49 = vector.load %arg1[%c0_46, %c2_47, %c2_48, %c0_49] : memref<1x18x18x16xf32, #tpu.memory_space<vmem>>, vector<1x16x16x16xf32>
    %50 = vector.shape_cast %49 : vector<1x16x16x16xf32> to vector<16x16x16xf32>
    %51 = vector.shape_cast %50 : vector<16x16x16xf32> to vector<256x16xf32>
    %c128 = arith.constant 128 : index
    %c0_50 = arith.constant 0 : index
    %52 = vector.load %arg2[%c128, %c0_50] : memref<144x128xf32, #tpu.memory_space<vmem>>, vector<16x128xf32>
    %cst_51 = arith.constant dense<0.000000e+00> : vector<256x128xf32>
    %53 = tpu.matmul %51, %52, %cst_51 {dimension_numbers = #tpu.dot_dimension_numbers<[1], [0], [0], [1], [0, 0, 1, 1], [], []>} : vector<256x16xf32>, vector<16x128xf32>, vector<256x128xf32> -> vector<256x128xf32>
    %54 = arith.addf %48, %53 : vector<256x128xf32>
    %c0_52 = arith.constant 0 : index
    %c0_53 = arith.constant 0 : index
    %55 = vector.load %arg3[%c0_52, %c0_53] : memref<2x128xf32, #tpu.memory_space<vmem>>, vector<1x128xf32>
    %c1_54 = arith.constant 1 : index
    %c0_55 = arith.constant 0 : index
    %56 = vector.load %arg3[%c1_54, %c0_55] : memref<2x128xf32, #tpu.memory_space<vmem>>, vector<1x128xf32>
    %57 = vector.broadcast %55 : vector<1x128xf32> to vector<256x128xf32>
    %58 = arith.mulf %54, %57 : vector<256x128xf32>
    %59 = vector.broadcast %56 : vector<1x128xf32> to vector<256x128xf32>
    %60 = arith.addf %58, %59 : vector<256x128xf32>
    %cst_56 = arith.constant 0.000000e+00 : f32
    %61 = vector.broadcast %cst_56 : f32 to vector<256x128xf32>
    %62 = arith.cmpf ogt, %60, %61 : vector<256x128xf32>
    %cst_57 = arith.constant 1.000000e-01 : f32
    %63 = vector.broadcast %cst_57 : f32 to vector<256x128xf32>
    %64 = arith.mulf %60, %63 : vector<256x128xf32>
    %65 = arith.select %62, %60, %64 : vector<256x128xi1>, vector<256x128xf32>
    %66 = vector.shape_cast %65 : vector<256x128xf32> to vector<16x16x128xf32>
    %c0_58 = arith.constant 0 : index
    %c0_59 = arith.constant 0 : index
    %c0_60 = arith.constant 0 : index
    %c0_61 = arith.constant 0 : index
    %67 = vector.load %arg4[%c0_58, %c0_59, %c0_60, %c0_61] : memref<1x16x16x128xf32, #tpu.memory_space<vmem>>, vector<1x16x16x128xf32>
    %68 = vector.shape_cast %67 : vector<1x16x16x128xf32> to vector<16x16x128xf32>
    %69 = vector.shape_cast %66 : vector<16x16x128xf32> to vector<1x16x16x128xf32>
    tpu.vector_store %arg4[%c0_58, %c0_59, %c0_60, %c0_61], %69 {strides = array<i32>} : memref<1x16x16x128xf32, #tpu.memory_space<vmem>>, vector<1x16x16x128xf32>,
    return
  }
  func.func @transform_0(%arg0: i32) -> (i32, i32, i32, i32) {
    %c0_i32 = arith.constant 0 : i32
    %c0_i32_0 = arith.constant 0 : i32
    %c0_i32_1 = arith.constant 0 : i32
    %c0_i32_2 = arith.constant 0 : i32
    return %arg0, %c0_i32, %c0_i32_0, %c0_i32_1 : i32, i32, i32, i32
  }
  func.func @transform_1(%arg0: i32) -> (i32, i32) {
    %c0_i32 = arith.constant 0 : i32
    %c0_i32_0 = arith.constant 0 : i32
    %c0_i32_1 = arith.constant 0 : i32
    return %c0_i32, %c0_i32_0 : i32, i32
  }
  func.func @transform_2(%arg0: i32) -> (i32, i32) {
    %c0_i32 = arith.constant 0 : i32
    %c0_i32_0 = arith.constant 0 : i32
    %c0_i32_1 = arith.constant 0 : i32
    return %c0_i32, %c0_i32_0 : i32, i32
  }
  func.func @transform_3(%arg0: i32) -> (i32, i32, i32, i32) {
    %c0_i32 = arith.constant 0 : i32
    %c0_i32_0 = arith.constant 0 : i32
    %c0_i32_1 = arith.constant 0 : i32
    %c0_i32_2 = arith.constant 0 : i32
    return %arg0, %c0_i32, %c0_i32_0, %c0_i32_1 : i32, i32, i32, i32
  }
}

</mosaic_0001>

<bundles_post_ra>
// kernel: tpu_custom_call.1
= control target key start
LH: loop header
LB: loop body
LE: loop exit
PB: predicated region body
PF: predicated region fallthrough
CT: control target
= control target key end

     0   :  { %8 = vsyncpa [#allocation3], 0  ;;  %s4710_s0 = inlined_call_operand.vmem [shape: f32[2,18,18,16], index: 0, kind: input, shape index: {}]   ;;  %s4711_s1 = inlined_call_operand.vmem [shape: f32[144,128], index: 1, kind: input, shape index: {}]   ;;  %s4712_s2 = inlined_call_operand.vmem [shape: f32[2,128], index: 2, kind: input, shape index: {}]   ;;  %s4713_s3 = inlined_call_operand.hbm [shape: f32[2,16,16,128], index: 3, kind: output, shape index: {}]  }
   0x1   :  { %10 = vsyncpa [#allocation3 + $0x1], 0  ;;  %s3487_s12 = smov 0   ;;  %s3489_s13 = smov 0  }
   0x2   :  { %s3491_s14 = smov 0   ;;  %s3493_s15 = smov 0  }
   0x3 LB: > { %s3508_s16 = sadd.s32 4294967295, %s3463_s15   ;;  %s2857_s17 = sadd.s32 4294967294, %s3463_s15   ;;  %s3463_s15 = sphi %s3493_s15, %s4815_s15   ;;  %s3459_s14 = sphi %s3491_s14, %s4814_s14   ;;  %s3455_s13 = sphi %s3489_s13, %s4813_s13   ;;  %s3451_s12 = sphi %s3487_s12, %s4812_s12  }
   0x4   : > { %s3512_s18 = sadd.s32 1, %s3463_s15   ;;  %s91_s19 = sadd.s32 1, %s3459_s14 }
   0x5   : > { %s88_s20 = ssub.s32 %s3463_s15, %s3512_s18  ;;  %p101_p0 = scmp.ne.s32.totalorder %s3459_s14, %s3455_s13 }
   0x6   : > { %p89_p1 = scmp.eq.s32.totalorder %s88_s20, 0  ;;  %p102_p2 = scmp.eq.s32.totalorder %s3508_s16, 1 }
   0x7   : > { %p107_p3 = scmp.ne.s32.totalorder %s3455_s13, %s3451_s12  ;;  %p108_p4 = scmp.eq.s32.totalorder %s2857_s17, 1 }
   0x8   : > { %s3523_s21 = scalar_select %p89_p1, %s3459_s14, %s91_s19  }
   0x9   : > { %p3525_p5 = por %p102_p2, %p101_p0  ;;  %p3529_p6 = por %p108_p4, %p107_p3 }
   0xa   : > { %p2860_p7 = scmp.ge.s32.totalorder %s3463_s15, 1  ;;  %p140_p8 = scmp.lt.s32.totalorder %s3463_s15, 3 }
   0xc   : > { %p141_p9 = pnand %p2860_p7, %p140_p8 }
   0xe   : > { %144 = sbr.rel (%p141_p9) target bundleno = 745 (0x2e9), region = 32 }
  0x13   : > { %v236_v0 = vld [vmem:[%s4711_s1 + $0x18] sm:$0xff]  ;;  %v235_v1 = vld [vmem:[%s4711_s1 + $0x10] sm:$0xff]  ;;  %p164_p10 = scmp.lt.s32.totalorder %s3508_s16, 1  ;;  %v689_v2 = vld [vmem:[%s4711_s1 + $0x28] sm:$0xff]  ;;  %vm237_vm0 = vcmask 130048   ;;  %s3348_s20 = sshll.u32 %s3508_s16, 8 }
  0x14   : > { %3349 = vmatpush.msra.mxu1 %v236_v0  ;;  %3350 = vmatpush.msra.mxu2 %v236_v0  ;;  %v965_v3 = vld [vmem:[%s4711_s1 + $0x38] sm:$0xff]  ;;  %v202_v4 = vld [vmem:[%s4711_s1 + $0x8] sm:$0xff]  ;;  %v688_v10 = vld [vmem:[%s4711_s1 + $0x20] sm:$0xff]  ;;  %s2791_s26 = scalar_lea.hbm %s4713_s3, %s3348_s20  ;;  %s3421_s7 = scalar_lea.hbm %s4713_s3, 512 }
  0x15   : > { %3351 = vmatpush.msra.mxu3 %v236_v0  ;;  %s165_s5 = scalar_select %p164_p10, %s3508_s16, 1  ;;  %348 = vmatpush.msra.mxu0 %v236_v0  ;;  %v1240_v5 = vld [vmem:[%s4711_s1 + $0x48] sm:$0xff]  ;;  %v964_v13 = vld [vmem:[%s4711_s1 + $0x30] sm:$0xff]  ;;  %v201_v16 = vld [vmem:[%s4711_s1] sm:$0xff] }
  0x16   : > { %3352 = vmatpush.msra.mxu1 %v235_v1  ;;  %3353 = vmatpush.msra.mxu2 %v235_v1  ;;  %v1239_v17 = vld [vmem:[%s4711_s1 + $0x40] sm:$0xff]  ;;  %v1791_v30 = vld [vmem:[%s4711_s1 + $0x68] sm:$0xff]  ;;  %v2066_v31 = vld [vmem:[%s4711_s1 + $0x78] sm:$0xff]  ;;  %s2794_s28 = sshll.u32 %s2791_s26, 4  ;;  %s2795_s28 = int_to_ptr.hbm [resolvable:$true] %s2794_s28 }
  0x17   : > { %s3355_s8 = smul.u32 432, %s165_s5  ;;  %3354 = vmatpush.msra.mxu3 %v235_v1  ;;  %349 = vmatpush.msra.mxu0 %v235_v1  ;;  %v1515_v32 = vld [vmem:[%s4711_s1 + $0x58] sm:$0xff]  ;;  %v2341_v37 = vld [vmem:[%s4711_s1 + $0x88] sm:$0xff]  ;;  %s161_s5 = sand.u32 1, %s3455_s13  }
  0x18   : > { %800 = vmatpush.msrb.mxu2 %v689_v2  ;;  %557 = vmatpush.msrb.mxu1 %v202_v4  ;;  %s2780_s16 = scalar_lea.sflag [#allocation3], %s161_s5  ;;  %s3415_s29 = sshra.s32 %s2795_s28, 4  ;;  %s3416_s29 = int_to_ptr.hbm [resolvable:$true] %s3415_s29 }
  0x19   : > { %1076 = vmatpush.msrb.mxu3 %v965_v3  ;;  %s3558_s19 = scalar_lea.vmem %s4710_s0, %s3355_s8  ;;  %1351 = vmatpush.msrb.mxu0 %v1240_v5  ;;  %s2861_s8 = sshll.u32 %s161_s5, 8 }
  0x1a   : > { %v3561_v6 = vld [vmem:[%s3558_s19 + $0x61] sm:$0xff]  ;;  %v3581_v11 = vld [vmem:[%s3558_s19 + $0x69] sm:$0xff]  ;;  %801 = vmatpush.msrb.mxu2 %v688_v10  ;;  %558 = vmatpush.msrb.mxu1 %v201_v16  ;;  %v3607_v18 = vld [vmem:[%s3558_s19 + $0x79] sm:$0xff]  ;;  %s4450_s9 = scalar_lea.vmem [#allocation2], %s2861_s8  ;;  %s3417_s30 = scalar_lea.hbm %s3416_s29, 256 }
  0x1b   : > { %v3564_v7 = vld [vmem:[%s3558_s19 + $0xc1] sm:$0xff]  ;;  %2871 = vmatmul.msk.f32.vlgmr.msra.gmra.mxu1 %vm237_vm0, %v3561_v6  ;;  %v3584_v12 = vld [vmem:[%s3558_s19 + $0xc9] sm:$0xff]  ;;  %1077 = vmatpush.msrb.mxu3 %v964_v13  ;;  %v3610_v19 = vld [vmem:[%s3558_s19 + $0xd9] sm:$0xff]  ;;  %s2792_s27 = sshll.u32 %s4450_s9, 4  ;;  %p3418_p11 = scmp.ne.s32.totalorder %s3416_s29, %s3417_s30  ;;  %s2793_s27 = int_to_ptr.vmem [resolvable:$true] %s2792_s27 }
  0x1c   : > { %v3567_v8 = vld [vmem:[%s3558_s19 + $0x121] sm:$0xff]  ;;  %2879 = vmatmul.msk.f32.vlgmr.msra.gmra.mxu2 %vm237_vm0, %v3564_v7  ;;  %v3590_v14 = vld [vmem:[%s3558_s19 + $0x129] sm:$0xff]  ;;  %1352 = vmatpush.msrb.mxu0 %v1239_v17  ;;  %v3613_v20 = vld [vmem:[%s3558_s19 + $0x139] sm:$0xff]  ;;  %p3422_p0 = scmp.lt.s32.totalorder %s3416_s29, %s4713_s3  ;;  %p3423_p1 = scmp.lt.s32.totalorder %s3421_s7, %s3417_s30 }
  0x1d   : > { %v203_v9 = vld [vmem:[%s3558_s19 + $0x1] sm:$0xff]  ;;  %2887 = vmatmul.msk.f32.vlgmr.msra.gmra.mxu3 %vm237_vm0, %v3567_v8  ;;  %v204_v15 = vld [vmem:[%s3558_s19 + $0x9] sm:$0xff]  ;;  %v205_v21 = vld [vmem:[%s3558_s19 + $0x19] sm:$0xff]  ;;  %1902 = vmatpush.msra.mxu2 %v1791_v30  ;;  %p3419_p12 = pnand %p3418_p11, %p3525_p5 }
  0x1e   : > { %2863 = vmatmul.msk.f32.vlgmr.msra.gmra.mxu0 %vm237_vm0, %v203_v9  ;;  %v3624_v22 = vld [vmem:[%s3558_s19 + $0x81] sm:$0xff]  ;;  %v3641_v26 = vld [vmem:[%s3558_s19 + $0x91] sm:$0xff]  ;;  %2177 = vmatpush.msra.mxu3 %v2066_v31  ;;  %v3670_v33 = vld [vmem:[%s3558_s19 + $0x99] sm:$0xff]  ;;  %p3424_p2 = por %p3423_p1, %p3422_p0 }
  0x1f   : > { %v3627_v23 = vld [vmem:[%s3558_s19 + $0xe1] sm:$0xff]  ;;  %v3644_v27 = vld [vmem:[%s3558_s19 + $0xf1] sm:$0xff]  ;;  %1626 = vmatpush.msra.mxu1 %v1515_v32  ;;  %v3673_v34 = vld [vmem:[%s3558_s19 + $0xf9] sm:$0xff]  ;;  %2452 = vmatpush.msra.mxu0 %v2341_v37  ;;  %p3420_p13 = pneg %p3419_p12 }
  0x20   : > { %v3630_v24 = vld [vmem:[%s3558_s19 + $0x141] sm:$0xff]  ;;  %v3647_v28 = vld [vmem:[%s3558_s19 + $0x151] sm:$0xff]  ;;  %v3676_v35 = vld [vmem:[%s3558_s19 + $0x159] sm:$0xff] }
  0x21   : > { %v206_v25 = vld [vmem:[%s3558_s19 + $0x21] sm:$0xff]  ;;  %v3650_v29 = vld [vmem:[%s3558_s19 + $0x31] sm:$0xff]  ;;  %v3679_v36 = vld [vmem:[%s3558_s19 + $0x39] sm:$0xff]  ;;  %p3425_p3 = pnand %p3424_p2, %p3420_p13 }
  0x22   : > { %v3693_v38 = vld [vmem:[%s3558_s19 + $0xa9] sm:$0xff]  ;;  %v3713_v42 = vld [vmem:[%s3558_s19 + $0xb1] sm:$0xff]  ;;  %v169_v46 = vld [vmem:[%s3558_s19] sm:$0xff] }
  0x23   : > { %2872 = vmatmul.msk.f32.gmra.mxu1 %vm237_vm0, %v3581_v11  ;;  %v3696_v39 = vld [vmem:[%s3558_s19 + $0x109] sm:$0xff]  ;;  %v3716_v43 = vld [vmem:[%s3558_s19 + $0x111] sm:$0xff]  ;;  %v2960_v51 = vld [vmem:[%s3558_s19 + $0x20] sm:$0xff] }
  0x24   : > { %2880 = vmatmul.msk.f32.gmra.mxu2 %vm237_vm0, %v3584_v12  ;;  %v3699_v40 = vld [vmem:[%s3558_s19 + $0x169] sm:$0xff]  ;;  %v3719_v44 = vld [vmem:[%s3558_s19 + $0x171] sm:$0xff]  ;;  %v3747_v52 = vld [vmem:[%s3558_s19 + $0x1a] sm:$0xff] }
  0x25   : > { %2888 = vmatmul.msk.f32.gmra.mxu3 %vm237_vm0, %v3590_v14  ;;  %v3702_v41 = vld [vmem:[%s3558_s19 + $0x49] sm:$0xff]  ;;  %v3722_v45 = vld [vmem:[%s3558_s19 + $0x51] sm:$0xff]  ;;  %v3787_v58 = vld [vmem:[%s3558_s19 + $0x3a] sm:$0xff] }
  0x26   : > { %2864 = vmatmul.msk.f32.gmra.mxu0 %vm237_vm0, %v204_v15  ;;  %v656_v47 = vld [vmem:[%s3558_s19 + $0x2] sm:$0xff]  ;;  %v2959_v48 = vld [vmem:[%s3558_s19 + $0x18] sm:$0xff]  ;;  %v657_v50 = vld [vmem:[%s3558_s19 + $0xa] sm:$0xff] }
  0x27   : > { %v170_v49 = vld [vmem:[%s3558_s19 + $0x8] sm:$0xff]  ;;  %v3750_v53 = vld [vmem:[%s3558_s19 + $0x30] sm:$0xff]  ;;  %v3763_v55 = vld [vmem:[%s3558_s19 + $0x38] sm:$0xff] }
  0x28   : > { %v3760_v54 = vld [vmem:[%s3558_s19 + $0x22] sm:$0xff]  ;;  %v3773_v56 = vld [vmem:[%s3558_s19 + $0x32] sm:$0xff]  ;;  %v3801_v60 = vld [vmem:[%s3558_s19 + $0x4a] sm:$0xff] }
  0x29   : > { %v3776_v57 = vld [vmem:[%s3558_s19 + $0x48] sm:$0xff]  ;;  %v3790_v59 = vld [vmem:[%s3558_s19 + $0x50] sm:$0xff]  ;;  %v3804_v61 = vld [vmem:[%s3558_s19 + $0x60] sm:$0xff] }
  0x2a   : > { %v3815_v62 = vld [vmem:[%s3558_s19 + $0x52] sm:$0xff]  ;;  %v3818_v63 = vld [vmem:[%s3558_s19 + $0x68] sm:$0xff]  ;;  %v3856_v10 = vld [vmem:[%s3558_s19 + $0x80] sm:$0xff] }
  0x2b   : > { %2873 = vmatmul.msk.f32.gmra.mxu1 %vm237_vm0, %v3607_v18  ;;  %4740 = vst [vmem:[#allocation5_spill] sm:$0xff] %v3818_v63  ;;  %v3831_v1 = vld [vmem:[%s3558_s19 + $0x62] sm:$0xff]  ;;  %v3834_v2 = vld [vmem:[%s3558_s19 + $0x78] sm:$0xff]  ;;  %v3853_v9 = vld [vmem:[%s3558_s19 + $0x6a] sm:$0xff] }
  0x2c   : > { %2881 = vmatmul.msk.f32.gmra.mxu2 %vm237_vm0, %v3610_v19  ;;  %4741 = vst [vmem:[#allocation6_spill] sm:$0xff] %v3834_v2  ;;  %v3875_v17 = vld [vmem:[%s3558_s19 + $0x7a] sm:$0xff]  ;;  %v3897_v31 = vld [vmem:[%s3558_s19 + $0x82] sm:$0xff] }
  0x2d   : > { %2889 = vmatmul.msk.f32.gmra.mxu3 %vm237_vm0, %v3613_v20  ;;  %4743 = vst [vmem:[#allocation8_spill] sm:$0xff] %v3853_v9  ;;  %v3900_v32 = vld [vmem:[%s3558_s19 + $0x98] sm:$0xff] }
  0x2e   : > { %2865 = vmatmul.msk.f32.gmra.mxu0 %vm237_vm0, %v205_v21  ;;  %4744 = vst [vmem:[#allocation9_spill] sm:$0xff] %v3856_v10 }
  0x2f   : > { %4746 = vst [vmem:[#allocation11_spill] sm:$0xff] %v3875_v17 }
  0x30   : > { %4749 = vst [vmem:[#allocation14_spill] sm:$0xff] %v3897_v31 }
  0x31   : > { %4750 = vst [vmem:[#allocation15_spill] sm:$0xff] %v3900_v32 }
  0x33   : > { %2874 = vmatmul.msk.f32.gmra.mxu1 %vm237_vm0, %v3624_v22 }
  0x34   : > { %2882 = vmatmul.msk.f32.gmra.mxu2 %vm237_vm0, %v3627_v23 }
  0x35   : > { %2890 = vmatmul.msk.f32.gmra.mxu3 %vm237_vm0, %v3630_v24 }
  0x36   : > { %2866 = vmatmul.msk.f32.gmra.mxu0 %vm237_vm0, %v206_v25 }
  0x3b   : > { %2875 = vmatmul.msk.f32.gmra.mxu1 %vm237_vm0, %v3641_v26 }
  0x3c   : > { %2883 = vmatmul.msk.f32.gmra.mxu2 %vm237_vm0, %v3644_v27 }
  0x3d   : > { %2891 = vmatmul.msk.f32.gmra.mxu3 %vm237_vm0, %v3647_v28 }
  0x3e   : > { %2867 = vmatmul.msk.f32.gmra.mxu0 %vm237_vm0, %v3650_v29 }
  0x43   : > { %2876 = vmatmul.msk.f32.gmra.mxu1 %vm237_vm0, %v3670_v33 }
  0x44   : > { %2884 = vmatmul.msk.f32.gmra.mxu2 %vm237_vm0, %v3673_v34 }
  0x45   : > { %2892 = vmatmul.msk.f32.gmra.mxu3 %vm237_vm0, %v3676_v35 }
  0x46   : > { %2868 = vmatmul.msk.f32.gmra.mxu0 %vm237_vm0, %v3679_v36 }
  0x4b   : > { %2877 = vmatmul.msk.f32.gmra.mxu1 %vm237_vm0, %v3693_v38 }
  0x4c   : > { %2885 = vmatmul.msk.f32.gmra.mxu2 %vm237_vm0, %v3696_v39 }
  0x4d   : > { %2893 = vmatmul.msk.f32.gmra.mxu3 %vm237_vm0, %v3699_v40 }
  0x4e   : > { %2869 = vmatmul.msk.f32.gmra.mxu0 %vm237_vm0, %v3702_v41 }
  0x53   : > { %2878 = vmatmul.msk.f32.gmra.mxu1 %vm237_vm0, %v3713_v42 }
  0x54   : > { %2886 = vmatmul.msk.f32.gmra.mxu2 %vm237_vm0, %v3716_v43 }
  0x55   : > { %2894 = vmatmul.msk.f32.gmra.mxu3 %vm237_vm0, %v3719_v44 }
  0x56   : > { %2870 = vmatmul.msk.f32.gmra.mxu0 %vm237_vm0, %v3722_v45 }
  0x5b   : > { %2895 = vmatmul.msk.f32.vlgmr.msrb.gmra.mxu1 %vm237_vm0, %v169_v46 }
  0x5c   : > { %2927 = vmatmul.msk.f32.vlgmr.msrb.gmra.mxu2 %vm237_vm0, %v656_v47 }
  0x5d   : > { %2991 = vmatmul.msk.f32.vlgmr.msrb.gmra.mxu3 %vm237_vm0, %v2959_v48 }
  0x5e   : > { %3055 = vmatmul.msk.f32.vlgmr.msrb.gmra.mxu0 %vm237_vm0, %v205_v21 }
  0x63   : > { %2896 = vmatmul.msk.f32.gmra.mxu1 %vm237_vm0, %v170_v49  ;;  %v3922_v49 = vld [vmem:[%s3558_s19 + $0xa8] sm:$0xff] }
  0x64   : > { %2928 = vmatmul.msk.f32.gmra.mxu2 %vm237_vm0, %v657_v50  ;;  %4753 = vst [vmem:[#allocation18_spill] sm:$0xff] %v3922_v49 }
  0x65   : > { %2992 = vmatmul.msk.f32.gmra.mxu3 %vm237_vm0, %v2960_v51 }
  0x66   : > { %3056 = vmatmul.msk.f32.gmra.mxu0 %vm237_vm0, %v206_v25 }
  0x6b   : > { %2897 = vmatmul.msk.f32.gmra.mxu1 %vm237_vm0, %v2959_v48  ;;  %v3919_v48 = vld [vmem:[%s3558_s19 + $0x92] sm:$0xff] }
  0x6c   : > { %2929 = vmatmul.msk.f32.gmra.mxu2 %vm237_vm0, %v3747_v52  ;;  %4752 = vst [vmem:[#allocation17_spill] sm:$0xff] %v3919_v48 }
  0x6d   : > { %2993 = vmatmul.msk.f32.gmra.mxu3 %vm237_vm0, %v3750_v53 }
  0x6e   : > { %3057 = vmatmul.msk.f32.gmra.mxu0 %vm237_vm0, %v3650_v29 }
  0x73   : > { %2898 = vmatmul.msk.f32.gmra.mxu1 %vm237_vm0, %v2960_v51  ;;  %v2065_v51 = vld [vmem:[%s4711_s1 + $0x70] sm:$0xff] }
  0x74   : > { %2930 = vmatmul.msk.f32.gmra.mxu2 %vm237_vm0, %v3760_v54  ;;  %2178 = vmatpush.msra.mxu3 %v2065_v51 }
  0x75   : > { %2994 = vmatmul.msk.f32.gmra.mxu3 %vm237_vm0, %v3763_v55 }
  0x76   : > { %3058 = vmatmul.msk.f32.gmra.mxu0 %vm237_vm0, %v3679_v36 }
  0x7b   : > { %2899 = vmatmul.msk.f32.gmra.mxu1 %vm237_vm0, %v3750_v53 }
  0x7c   : > { %2931 = vmatmul.msk.f32.gmra.mxu2 %vm237_vm0, %v3773_v56 }
  0x7d   : > { %2995 = vmatmul.msk.f32.gmra.mxu3 %vm237_vm0, %v3776_v57 }
  0x7e   : > { %3059 = vmatmul.msk.f32.gmra.mxu0 %vm237_vm0, %v3702_v41 }
  0x83   : > { %2900 = vmatmul.msk.f32.gmra.mxu1 %vm237_vm0, %v3763_v55 }
  0x84   : > { %2932 = vmatmul.msk.f32.gmra.mxu2 %vm237_vm0, %v3787_v58 }
  0x85   : > { %2996 = vmatmul.msk.f32.gmra.mxu3 %vm237_vm0, %v3790_v59 }
  0x86   : > { %3060 = vmatmul.msk.f32.gmra.mxu0 %vm237_vm0, %v3722_v45 }
  0x8b   : > { %2901 = vmatmul.msk.f32.gmra.mxu1 %vm237_vm0, %v3776_v57 }
  0x8c   : > { %2933 = vmatmul.msk.f32.gmra.mxu2 %vm237_vm0, %v3801_v60 }
  0x8d   : > { %2997 = vmatmul.msk.f32.gmra.mxu3 %vm237_vm0, %v3804_v61 }
  0x8e   : > { %3061 = vmatmul.msk.f32.gmra.mxu0 %vm237_vm0, %v3561_v6 }
  0x93   : > { %2902 = vmatmul.msk.f32.gmra.mxu1 %vm237_vm0, %v3790_v59 }
  0x94   : > { %2934 = vmatmul.msk.f32.gmra.mxu2 %vm237_vm0, %v3815_v62 }
  0x95   : > { %2998 = vmatmul.msk.f32.gmra.mxu3 %vm237_vm0, %v3818_v63 }
  0x96   : > { %3062 = vmatmul.msk.f32.gmra.mxu0 %vm237_vm0, %v3581_v11 }
  0x98   : > { %v3828_v0 = vpop.f32.mrf.mxu1 }
  0x9b   : > { %v3836_v3 = vpop.f32.mrf.mxu0  ;;  %2903 = vmatmul.msk.f32.gmra.mxu1 %vm237_vm0, %v3804_v61 }
  0x9c   : > { %2935 = vmatmul.msk.f32.gmra.mxu2 %vm237_vm0, %v3831_v1 }
  0x9d   : > { %2999 = vmatmul.msk.f32.gmra.mxu3 %vm237_vm0, %v3834_v2 }
  0x9e   : > { %3063 = vmatmul.msk.f32.gmra.mxu0 %vm237_vm0, %v3607_v18  ;;  %v3878_v18 = vld [vmem:[%s3558_s19 + $0x90] sm:$0xff] }
  0x9f   : > { %v3846_v4 = vpop.f32.mrf.mxu2  ;;  %4747 = vst [vmem:[#allocation12_spill] sm:$0xff] %v3878_v18 }
  0xa0   : > { %v3848_v5 = vpop.f32.mrf.mxu3  ;;  %v3850_v6 = vpop.f32.mrf.mxu1 }
  0xa1   : > { %4742 = vst [vmem:[#allocation7_spill] sm:$0xff] %v3848_v5 }
  0xa3   : > { %v3858_v11 = vpop.f32.mrf.mxu0  ;;  %2904 = vmatmul.msk.f32.gmra.mxu1 %vm237_vm0, %v3818_v63  ;;  %v4035_v63 = vld [vmem:[%s3558_s19 + $0xe0] sm:$0xff] }
  0xa4   : > { %2936 = vmatmul.msk.f32.gmra.mxu2 %vm237_vm0, %v3853_v9  ;;  %v4032_v9 = vld [vmem:[%s3558_s19 + $0xca] sm:$0xff] }
  0xa5   : > { %3000 = vmatmul.msk.f32.gmra.mxu3 %vm237_vm0, %v3856_v10 }
  0xa6   : > { %3064 = vmatmul.msk.f32.gmra.mxu0 %vm237_vm0, %v3624_v22 }
  0xa7   : > { %v3868_v13 = vpop.f32.mrf.mxu2 }
  0xa8   : > { %v3870_v15 = vpop.f32.mrf.mxu3  ;;  %v3872_v16 = vpop.f32.mrf.mxu1 }
  0xa9   : > { %4745 = vst [vmem:[#allocation10_spill] sm:$0xff] %v3870_v15  ;;  %v1514_v15 = vld [vmem:[%s4711_s1 + $0x50] sm:$0xff] }
  0xaa   : > { %1627 = vmatpush.msra.mxu1 %v1514_v15  ;;  %v2340_v15 = vld [vmem:[%s4711_s1 + $0x80] sm:$0xff] }
  0xab   : > { %v3880_v21 = vpop.f32.mrf.mxu0  ;;  %2905 = vmatmul.msk.f32.gmra.mxu1 %vm237_vm0, %v3834_v2  ;;  %2453 = vmatpush.msra.mxu0 %v2340_v15  ;;  %v4020_v2 = vld [vmem:[%s3558_s19 + $0xd8] sm:$0xff] }
  0xac   : > { %2937 = vmatmul.msk.f32.gmra.mxu2 %vm237_vm0, %v3875_v17 }
  0xad   : > { %3001 = vmatmul.msk.f32.gmra.mxu3 %vm237_vm0, %v3878_v18 }
  0xae   : > { %3065 = vmatmul.msk.f32.gmra.mxu0 %vm237_vm0, %v3641_v26 }
  0xaf   : > { %v3890_v22 = vpop.f32.mrf.mxu2 }
  0xb0   : > { %v3892_v25 = vpop.f32.mrf.mxu3  ;;  %v3894_v30 = vpop.f32.mrf.mxu1 }
  0xb1   : > { %4748 = vst [vmem:[#allocation13_spill] sm:$0xff] %v3892_v25 }
  0xb3   : > { %v3902_v37 = vpop.f32.mrf.mxu0  ;;  %2906 = vmatmul.msk.f32.gmra.mxu1 %vm237_vm0, %v3856_v10  ;;  %v3997_v10 = vld [vmem:[%s3558_s19 + $0xb2] sm:$0xff] }
  0xb4   : > { %2938 = vmatmul.msk.f32.gmra.mxu2 %vm237_vm0, %v3897_v31  ;;  %4764 = vst [vmem:[#allocation29_spill] sm:$0xff] %v3997_v10 }
  0xb5   : > { %3002 = vmatmul.msk.f32.gmra.mxu3 %vm237_vm0, %v3900_v32 }
  0xb6   : > { %3066 = vmatmul.msk.f32.gmra.mxu0 %vm237_vm0, %v3670_v33  ;;  %v1790_v33 = vld [vmem:[%s4711_s1 + $0x60] sm:$0xff] }
  0xb7   : > { %v3912_v26 = vpop.f32.mrf.mxu2  ;;  %1903 = vmatpush.msra.mxu2 %v1790_v33 }
  0xb8   : > { %v3914_v46 = vpop.f32.mrf.mxu3  ;;  %v3916_v47 = vpop.f32.mrf.mxu1 }
  0xb9   : > { %4751 = vst [vmem:[#allocation16_spill] sm:$0xff] %v3914_v46 }
  0xbb   : > { %v3924_v50 = vpop.f32.mrf.mxu0  ;;  %2907 = vmatmul.msk.f32.gmra.mxu1 %vm237_vm0, %v3878_v18 }
  0xbc   : > { %2939 = vmatmul.msk.f32.gmra.mxu2 %vm237_vm0, %v3919_v48  ;;  %v3950_v48 = vld [vmem:[%s3558_s19 + $0x9a] sm:$0xff] }
  0xbd   : > { %3003 = vmatmul.msk.f32.gmra.mxu3 %vm237_vm0, %v3922_v49  ;;  %4756 = vst [vmem:[#allocation21_spill] sm:$0xff] %v3950_v48 }
  0xbe   : > { %3067 = vmatmul.msk.f32.gmra.mxu0 %vm237_vm0, %v3693_v38  ;;  %v3953_v38 = vld [vmem:[%s3558_s19 + $0xb0] sm:$0xff] }
  0xbf   : > { %v3940_v46 = vpop.f32.mrf.mxu2  ;;  %4757 = vst [vmem:[#allocation22_spill] sm:$0xff] %v3953_v38 }
  0xc0   : > { %4754 = vst [vmem:[#allocation19_spill] sm:$0xff] %v3940_v46  ;;  %v3942_v25 = vpop.f32.mrf.mxu3  ;;  %v3947_v5 = vpop.f32.mrf.mxu1 }
  0xc1   : > { %4755 = vst [vmem:[#allocation20_spill] sm:$0xff] %v3942_v25 }
  0xc3   : > { %v3955_v18 = vpop.f32.mrf.mxu0  ;;  %2908 = vmatmul.msk.f32.gmra.mxu1 %vm237_vm0, %v3900_v32  ;;  %v3978_v32 = vld [vmem:[%s3558_s19 + $0xc0] sm:$0xff] }
  0xc4   : > { %2940 = vmatmul.msk.f32.gmra.mxu2 %vm237_vm0, %v3950_v48  ;;  %v3975_v48 = vld [vmem:[%s3558_s19 + $0xaa] sm:$0xff]  ;;  %4761 = vst [vmem:[#allocation26_spill] sm:$0xff] %v3978_v32 }
  0xc5   : > { %3004 = vmatmul.msk.f32.gmra.mxu3 %vm237_vm0, %v3953_v38  ;;  %4760 = vst [vmem:[#allocation25_spill] sm:$0xff] %v3975_v48 }
  0xc6   : > { %3068 = vmatmul.msk.f32.gmra.mxu0 %vm237_vm0, %v3713_v42 }
  0xc7   : > { %v3968_v33 = vpop.f32.mrf.mxu2 }
  0xc8   : > { %4758 = vst [vmem:[#allocation23_spill] sm:$0xff] %v3968_v33  ;;  %v3970_v51 = vpop.f32.mrf.mxu3  ;;  %v3972_v25 = vpop.f32.mrf.mxu1 }
  0xc9   : > { %4759 = vst [vmem:[#allocation24_spill] sm:$0xff] %v3970_v51 }
  0xcb   : > { %v3980_v31 = vpop.f32.mrf.mxu0  ;;  %2909 = vmatmul.msk.f32.gmra.mxu1 %vm237_vm0, %v3922_v49  ;;  %v4000_v49 = vld [vmem:[%s3558_s19 + $0xc8] sm:$0xff] }
  0xcc   : > { %2941 = vmatmul.msk.f32.gmra.mxu2 %vm237_vm0, %v3975_v48 }
  0xcd   : > { %3005 = vmatmul.msk.f32.gmra.mxu3 %vm237_vm0, %v3978_v32 }
  0xce   : > { %3069 = vmatmul.msk.f32.gmra.mxu0 %vm237_vm0, %v3564_v7 }
  0xcf   : > { %v3990_v42 = vpop.f32.mrf.mxu2 }
  0xd0   : > { %4762 = vst [vmem:[#allocation27_spill] sm:$0xff] %v3990_v42  ;;  %v3992_v15 = vpop.f32.mrf.mxu3  ;;  %v3994_v51 = vpop.f32.mrf.mxu1  ;;  %v4017_v42 = vld [vmem:[%s3558_s19 + $0xc2] sm:$0xff] }
  0xd1   : > { %4763 = vst [vmem:[#allocation28_spill] sm:$0xff] %v3992_v15 }
  0xd2   : > { %4767 = vst [vmem:[#allocation32_spill] sm:$0xff] %v4017_v42 }
  0xd3   : > { %v4002_v17 = vpop.f32.mrf.mxu0  ;;  %2910 = vmatmul.msk.f32.gmra.mxu1 %vm237_vm0, %v3953_v38 }
  0xd4   : > { %2942 = vmatmul.msk.f32.gmra.mxu2 %vm237_vm0, %v3997_v10 }
  0xd5   : > { %3006 = vmatmul.msk.f32.gmra.mxu3 %vm237_vm0, %v4000_v49 }
  0xd6   : > { %3070 = vmatmul.msk.f32.gmra.mxu0 %vm237_vm0, %v3584_v12 }
  0xd7   : > { %v4012_v7 = vpop.f32.mrf.mxu2 }
  0xd8   : > { %4765 = vst [vmem:[#allocation30_spill] sm:$0xff] %v4012_v7  ;;  %v4014_v15 = vpop.f32.mrf.mxu3  ;;  %v560_v48 = vpop.f32.mrf.mxu1 }
  0xd9   : > { %4766 = vst [vmem:[#allocation31_spill] sm:$0xff] %v4014_v15  ;;  %v561_v12 = vadd.f32 %v560_v48, %v3836_v3 }
  0xdb   : > { %v1354_v38 = vpop.f32.mrf.mxu0  ;;  %2911 = vmatmul.msk.f32.gmra.mxu1 %vm237_vm0, %v3978_v32 }
  0xdc   : > { %2943 = vmatmul.msk.f32.gmra.mxu2 %vm237_vm0, %v4017_v42 }
  0xdd   : > { %3007 = vmatmul.msk.f32.gmra.mxu3 %vm237_vm0, %v4020_v2 }
  0xde   : > { %3071 = vmatmul.msk.f32.gmra.mxu0 %vm237_vm0, %v3610_v19 }
  0xdf   : > { %v803_v15 = vpop.f32.mrf.mxu2 }
  0xe0   : > { %v899_v10 = vadd.f32 %v803_v15, %v561_v12  ;;  %v1079_v7 = vpop.f32.mrf.mxu3  ;;  %v563_v33 = vpop.f32.mrf.mxu1 }
  0xe1   : > { %v564_v19 = vadd.f32 %v563_v33, %v3858_v11 }
  0xe2   : > { %v1175_v32 = vadd.f32 %v1079_v7, %v899_v10  ;;  %v4052_v7 = vld [vmem:[%s3558_s19 + $0xf0] sm:$0xff] }
  0xe3   : > { %v1357_v42 = vpop.f32.mrf.mxu0  ;;  %2912 = vmatmul.msk.f32.gmra.mxu1 %vm237_vm0, %v4000_v49 }
  0xe4   : > { %v4037_v46 = vadd.f32 %v1354_v38, %v1175_v32  ;;  %2944 = vmatmul.msk.f32.gmra.mxu2 %vm237_vm0, %v4032_v9  ;;  %v4049_v38 = vld [vmem:[%s3558_s19 + $0xda] sm:$0xff] }
  0xe5   : > { %3008 = vmatmul.msk.f32.gmra.mxu3 %vm237_vm0, %v4035_v63 }
  0xe6   : > { %4768 = vst [vmem:[#allocation33_spill] sm:$0xff] %v4037_v46  ;;  %3072 = vmatmul.msk.f32.gmra.mxu0 %vm237_vm0, %v3627_v23 }
  0xe7   : > { %v806_v3 = vpop.f32.mrf.mxu2 }
  0xe8   : > { %v900_v10 = vadd.f32 %v806_v3, %v564_v19  ;;  %v1082_v48 = vpop.f32.mrf.mxu3  ;;  %v566_v32 = vpop.f32.mrf.mxu1  ;;  %v4066_v3 = vld [vmem:[%s3558_s19 + $0xe2] sm:$0xff] }
  0xe9   : > { %v567_v23 = vadd.f32 %v566_v32, %v3880_v21 }
  0xea   : > { %v1176_v15 = vadd.f32 %v1082_v48, %v900_v10  ;;  %v4069_v48 = vld [vmem:[%s3558_s19 + $0xf8] sm:$0xff] }
  0xeb   : > { %v1360_v12 = vpop.f32.mrf.mxu0  ;;  %2913 = vmatmul.msk.f32.gmra.mxu1 %vm237_vm0, %v4020_v2 }
  0xec   : > { %v4054_v46 = vadd.f32 %v1357_v42, %v1176_v15  ;;  %2945 = vmatmul.msk.f32.gmra.mxu2 %vm237_vm0, %v4049_v38 }
  0xed   : > { %3009 = vmatmul.msk.f32.gmra.mxu3 %vm237_vm0, %v4052_v7 }
  0xee   : > { %4769 = vst [vmem:[#allocation34_spill] sm:$0xff] %v4054_v46  ;;  %3073 = vmatmul.msk.f32.gmra.mxu0 %vm237_vm0, %v3644_v27 }
  0xef   : > { %v809_v11 = vpop.f32.mrf.mxu2 }
  0xf0   : > { %v901_v33 = vadd.f32 %v809_v11, %v567_v23  ;;  %v1085_v19 = vpop.f32.mrf.mxu3  ;;  %v569_v42 = vpop.f32.mrf.mxu1  ;;  %v4083_v11 = vld [vmem:[%s3558_s19 + $0xf2] sm:$0xff] }
  0xf1   : > { %v570_v27 = vadd.f32 %v569_v42, %v3902_v37 }
  0xf2   : > { %v1177_v10 = vadd.f32 %v1085_v19, %v901_v33  ;;  %v4086_v19 = vld [vmem:[%s3558_s19 + $0x108] sm:$0xff] }
  0xf3   : > { %v1363_v15 = vpop.f32.mrf.mxu0  ;;  %2914 = vmatmul.msk.f32.gmra.mxu1 %vm237_vm0, %v4035_v63 }
  0xf4   : > { %v4071_v46 = vadd.f32 %v1360_v12, %v1177_v10  ;;  %2946 = vmatmul.msk.f32.gmra.mxu2 %vm237_vm0, %v4066_v3 }
  0xf5   : > { %3010 = vmatmul.msk.f32.gmra.mxu3 %vm237_vm0, %v4069_v48 }
  0xf6   : > { %4770 = vst [vmem:[#allocation35_spill] sm:$0xff] %v4071_v46  ;;  %3074 = vmatmul.msk.f32.gmra.mxu0 %vm237_vm0, %v3673_v34 }
  0xf7   : > { %v812_v21 = vpop.f32.mrf.mxu2 }
  0xf8   : > { %v902_v32 = vadd.f32 %v812_v21, %v570_v27  ;;  %v1088_v23 = vpop.f32.mrf.mxu3  ;;  %v572_v12 = vpop.f32.mrf.mxu1  ;;  %v4100_v21 = vld [vmem:[%s3558_s19 + $0xfa] sm:$0xff] }
  0xf9   : > { %v573_v34 = vadd.f32 %v572_v12, %v3924_v50 }
  0xfa   : > { %v1178_v33 = vadd.f32 %v1088_v23, %v902_v32  ;;  %v4103_v23 = vld [vmem:[%s3558_s19 + $0x110] sm:$0xff] }
  0xfb   : > { %v1366_v10 = vpop.f32.mrf.mxu0  ;;  %2915 = vmatmul.msk.f32.gmra.mxu1 %vm237_vm0, %v4052_v7 }
  0xfc   : > { %v4088_v46 = vadd.f32 %v1363_v15, %v1178_v33  ;;  %2947 = vmatmul.msk.f32.gmra.mxu2 %vm237_vm0, %v4083_v11 }
  0xfd   : > { %3011 = vmatmul.msk.f32.gmra.mxu3 %vm237_vm0, %v4086_v19 }
  0xfe   : > { %4771 = vst [vmem:[#allocation36_spill] sm:$0xff] %v4088_v46  ;;  %3075 = vmatmul.msk.f32.gmra.mxu0 %vm237_vm0, %v3696_v39 }
  0xff   : > { %v815_v37 = vpop.f32.mrf.mxu2 }
 0x100   : > { %v903_v42 = vadd.f32 %v815_v37, %v573_v34  ;;  %v1091_v27 = vpop.f32.mrf.mxu3  ;;  %v575_v15 = vpop.f32.mrf.mxu1  ;;  %v4117_v37 = vld [vmem:[%s3558_s19 + $0x10a] sm:$0xff] }
 0x101   : > { %v576_v39 = vadd.f32 %v575_v15, %v3955_v18 }
 0x102   : > { %v1179_v32 = vadd.f32 %v1091_v27, %v903_v42  ;;  %v4120_v27 = vld [vmem:[%s3558_s19 + $0x120] sm:$0xff] }
 0x103   : > { %v1369_v33 = vpop.f32.mrf.mxu0  ;;  %2916 = vmatmul.msk.f32.gmra.mxu1 %vm237_vm0, %v4069_v48 }
 0x104   : > { %v4105_v46 = vadd.f32 %v1366_v10, %v1179_v32  ;;  %2948 = vmatmul.msk.f32.gmra.mxu2 %vm237_vm0, %v4100_v21 }
 0x105   : > { %3012 = vmatmul.msk.f32.gmra.mxu3 %vm237_vm0, %v4103_v23 }
 0x106   : > { %4772 = vst [vmem:[#allocation37_spill] sm:$0xff] %v4105_v46  ;;  %3076 = vmatmul.msk.f32.gmra.mxu0 %vm237_vm0, %v3716_v43 }
 0x107   : > { %v818_v50 = vpop.f32.mrf.mxu2 }
 0x108   : > { %v904_v12 = vadd.f32 %v818_v50, %v576_v39  ;;  %v1094_v34 = vpop.f32.mrf.mxu3  ;;  %v578_v10 = vpop.f32.mrf.mxu1  ;;  %v4134_v50 = vld [vmem:[%s3558_s19 + $0x112] sm:$0xff] }
 0x109   : > { %v579_v43 = vadd.f32 %v578_v10, %v3980_v31 }
 0x10a   : > { %v1180_v42 = vadd.f32 %v1094_v34, %v904_v12  ;;  %v2982_v34 = vld [vmem:[%s3558_s19 + $0x128] sm:$0xff] }
 0x10b   : > { %v1372_v32 = vpop.f32.mrf.mxu0  ;;  %2917 = vmatmul.msk.f32.gmra.mxu1 %vm237_vm0, %v4086_v19 }
 0x10c   : > { %v4122_v46 = vadd.f32 %v1369_v33, %v1180_v42  ;;  %2949 = vmatmul.msk.f32.gmra.mxu2 %vm237_vm0, %v4117_v37 }
 0x10d   : > { %3013 = vmatmul.msk.f32.gmra.mxu3 %vm237_vm0, %v4120_v27 }
 0x10e   : > { %4773 = vst [vmem:[#allocation38_spill] sm:$0xff] %v4122_v46  ;;  %3077 = vmatmul.msk.f32.gmra.mxu0 %vm237_vm0, %v3567_v8 }
 0x10f   : > { %v821_v18 = vpop.f32.mrf.mxu2 }
 0x110   : > { %v905_v15 = vadd.f32 %v821_v18, %v579_v43  ;;  %v1097_v39 = vpop.f32.mrf.mxu3  ;;  %v581_v33 = vpop.f32.mrf.mxu1 }
 0x111   : > { %v582_v8 = vadd.f32 %v581_v33, %v4002_v17 }
 0x112   : > { %v1181_v12 = vadd.f32 %v1097_v39, %v905_v15  ;;  %v2983_v39 = vld [vmem:[%s3558_s19 + $0x138] sm:$0xff] }
 0x113   : > { %v1375_v42 = vpop.f32.mrf.mxu0  ;;  %2918 = vmatmul.msk.f32.gmra.mxu1 %vm237_vm0, %v4103_v23 }
 0x114   : > { %v4137_v46 = vadd.f32 %v1372_v32, %v1181_v12  ;;  %2950 = vmatmul.msk.f32.gmra.mxu2 %vm237_vm0, %v4134_v50  ;;  %v4148_v32 = vld [vmem:[%s3558_s19 + $0x122] sm:$0xff] }
 0x115   : > { %3014 = vmatmul.msk.f32.gmra.mxu3 %vm237_vm0, %v2982_v34 }
 0x116   : > { %4774 = vst [vmem:[#allocation39_spill] sm:$0xff] %v4137_v46  ;;  %3078 = vmatmul.msk.f32.gmra.mxu0 %vm237_vm0, %v3590_v14 }
 0x117   : > { %v824_v31 = vpop.f32.mrf.mxu2 }
 0x118   : > { %v906_v10 = vadd.f32 %v824_v31, %v582_v8  ;;  %v1100_v43 = vpop.f32.mrf.mxu3  ;;  %v584_v18 = vpop.f32.mrf.mxu1 }
 0x119   : > { %v585_v14 = vadd.f32 %v584_v18, %v3828_v0 }
 0x11a   : > { %v1182_v15 = vadd.f32 %v1100_v43, %v906_v10  ;;  %v2984_v43 = vld [vmem:[%s3558_s19 + $0x140] sm:$0xff] }
 0x11b   : > { %v1378_v12 = vpop.f32.mrf.mxu0  ;;  %2919 = vmatmul.msk.f32.gmra.mxu1 %vm237_vm0, %v4120_v27 }
 0x11c   : > { %v4151_v46 = vadd.f32 %v1375_v42, %v1182_v15  ;;  %2951 = vmatmul.msk.f32.gmra.mxu2 %vm237_vm0, %v4148_v32  ;;  %v4162_v42 = vld [vmem:[%s3558_s19 + $0x12a] sm:$0xff] }
 0x11d   : > { %3015 = vmatmul.msk.f32.gmra.mxu3 %vm237_vm0, %v2983_v39 }
 0x11e   : > { %4775 = vst [vmem:[#allocation40_spill] sm:$0xff] %v4151_v46  ;;  %3079 = vmatmul.msk.f32.gmra.mxu0 %vm237_vm0, %v3613_v20 }
 0x11f   : > { %v827_v17 = vpop.f32.mrf.mxu2 }
 0x120   : > { %v907_v33 = vadd.f32 %v827_v17, %v585_v14  ;;  %v1103_v8 = vpop.f32.mrf.mxu3  ;;  %v587_v31 = vpop.f32.mrf.mxu1 }
 0x121   : > { %v588_v20 = vadd.f32 %v587_v31, %v3850_v6 }
 0x122   : > { %v1183_v10 = vadd.f32 %v1103_v8, %v907_v33  ;;  %v682_v33 = vld [vmem:[%s3558_s19 + $0x13a] sm:$0xff]  ;;  %v2985_v8 = vld [vmem:[%s3558_s19 + $0x150] sm:$0xff] }
 0x123   : > { %v1381_v15 = vpop.f32.mrf.mxu0  ;;  %2920 = vmatmul.msk.f32.gmra.mxu1 %vm237_vm0, %v2982_v34 }
 0x124   : > { %v4165_v46 = vadd.f32 %v1378_v12, %v1183_v10  ;;  %2952 = vmatmul.msk.f32.gmra.mxu2 %vm237_vm0, %v4162_v42 }
 0x125   : > { %3016 = vmatmul.msk.f32.gmra.mxu3 %vm237_vm0, %v2984_v43 }
 0x126   : > { %3080 = vmatmul.msk.f32.gmra.mxu0 %vm237_vm0, %v3630_v24 }
 0x127   : > { %v830_v0 = vpop.f32.mrf.mxu2 }
 0x128   : > { %v908_v18 = vadd.f32 %v830_v0, %v588_v20  ;;  %v1106_v14 = vpop.f32.mrf.mxu3  ;;  %v590_v17 = vpop.f32.mrf.mxu1 }
 0x129   : > { %v591_v24 = vadd.f32 %v590_v17, %v3872_v16 }
 0x12a   : > { %v1184_v12 = vadd.f32 %v1106_v14, %v908_v18  ;;  %v683_v18 = vld [vmem:[%s3558_s19 + $0x142] sm:$0xff]  ;;  %v2986_v14 = vld [vmem:[%s3558_s19 + $0x158] sm:$0xff] }
 0x12b   : > { %v1384_v34 = vpop.f32.mrf.mxu0  ;;  %2921 = vmatmul.msk.f32.gmra.mxu1 %vm237_vm0, %v2983_v39 }
 0x12c   : > { %v4176_v10 = vadd.f32 %v1381_v15, %v1184_v12  ;;  %2953 = vmatmul.msk.f32.gmra.mxu2 %vm237_vm0, %v682_v33 }
 0x12d   : > { %3017 = vmatmul.msk.f32.gmra.mxu3 %vm237_vm0, %v2985_v8 }
 0x12e   : > { %3081 = vmatmul.msk.f32.gmra.mxu0 %vm237_vm0, %v3647_v28 }
 0x12f   : > { %v833_v6 = vpop.f32.mrf.mxu2 }
 0x130   : > { %v909_v31 = vadd.f32 %v833_v6, %v591_v24  ;;  %v1109_v20 = vpop.f32.mrf.mxu3  ;;  %v593_v0 = vpop.f32.mrf.mxu1  ;;  %v684_v6 = vld [vmem:[%s3558_s19 + $0x152] sm:$0xff] }
 0x131   : > { %v594_v28 = vadd.f32 %v593_v0, %v3894_v30 }
 0x132   : > { %v1185_v15 = vadd.f32 %v1109_v20, %v909_v31  ;;  %v2987_v31 = vld [vmem:[%s3558_s19 + $0x168] sm:$0xff] }
 0x133   : > { %v1387_v12 = vpop.f32.mrf.mxu0  ;;  %2922 = vmatmul.msk.f32.gmra.mxu1 %vm237_vm0, %v2984_v43 }
 0x134   : > { %v4186_v39 = vadd.f32 %v1384_v34, %v1185_v15  ;;  %2954 = vmatmul.msk.f32.gmra.mxu2 %vm237_vm0, %v683_v18 }
 0x135   : > { %3018 = vmatmul.msk.f32.gmra.mxu3 %vm237_vm0, %v2986_v14 }
 0x136   : > { %3082 = vmatmul.msk.f32.gmra.mxu0 %vm237_vm0, %v3676_v35 }
 0x137   : > { %v836_v16 = vpop.f32.mrf.mxu2 }
 0x138   : > { %v910_v17 = vadd.f32 %v836_v16, %v594_v28  ;;  %v1112_v33 = vpop.f32.mrf.mxu3  ;;  %v596_v24 = vpop.f32.mrf.mxu1  ;;  %v685_v28 = vld [vmem:[%s3558_s19 + $0x15a] sm:$0xff]  ;;  %v2988_v16 = vld [vmem:[%s3558_s19 + $0x170] sm:$0xff] }
 0x139   : > { %v597_v35 = vadd.f32 %v596_v24, %v3916_v47 }
 0x13a   : > { %v1186_v34 = vadd.f32 %v1112_v33, %v910_v17 }
 0x13b   : > { %v1390_v20 = vpop.f32.mrf.mxu0  ;;  %2923 = vmatmul.msk.f32.gmra.mxu1 %vm237_vm0, %v2985_v8 }
 0x13c   : > { %v4196_v43 = vadd.f32 %v1387_v12, %v1186_v34  ;;  %2955 = vmatmul.msk.f32.gmra.mxu2 %vm237_vm0, %v684_v6  ;;  %v686_v34 = vld [vmem:[%s3558_s19 + $0x16a] sm:$0xff] }
 0x13d   : > { %3019 = vmatmul.msk.f32.gmra.mxu3 %vm237_vm0, %v2987_v31 }
 0x13e   : > { %3083 = vmatmul.msk.f32.gmra.mxu0 %vm237_vm0, %v3699_v40 }
 0x13f   : > { %v839_v30 = vpop.f32.mrf.mxu2 }
 0x140   : > { %v911_v0 = vadd.f32 %v839_v30, %v597_v35  ;;  %v1115_v18 = vpop.f32.mrf.mxu3  ;;  %v599_v15 = vpop.f32.mrf.mxu1 }
 0x141   : > { %v600_v40 = vadd.f32 %v599_v15, %v3947_v5 }
 0x142   : > { %v1187_v12 = vadd.f32 %v1115_v18, %v911_v0 }
 0x143   : > { %v1393_v8 = vpop.f32.mrf.mxu0  ;;  %2924 = vmatmul.msk.f32.gmra.mxu1 %vm237_vm0, %v2986_v14  ;;  %v3053_v14 = vld [vmem:[%s3558_s19 + $0x181] sm:$0xff] }
 0x144   : > { %v4206_v17 = vadd.f32 %v1390_v20, %v1187_v12  ;;  %2956 = vmatmul.msk.f32.gmra.mxu2 %vm237_vm0, %v685_v28  ;;  %v2989_v20 = vld [vmem:[%s3558_s19 + $0x180] sm:$0xff]  ;;  %v687_v12 = vld [vmem:[%s3558_s19 + $0x172] sm:$0xff] }
 0x145   : > { %3020 = vmatmul.msk.f32.gmra.mxu3 %vm237_vm0, %v2988_v16 }
 0x146   : > { %3084 = vmatmul.msk.f32.gmra.mxu0 %vm237_vm0, %v3719_v44 }
 0x147   : > { %v842_v47 = vpop.f32.mrf.mxu2 }
 0x148   : > { %v912_v33 = vadd.f32 %v842_v47, %v600_v40  ;;  %v1118_v24 = vpop.f32.mrf.mxu3  ;;  %v602_v6 = vpop.f32.mrf.mxu1  ;;  %v2990_v47 = vld [vmem:[%s3558_s19 + $0x188] sm:$0xff] }
 0x149   : > { %v603_v44 = vadd.f32 %v602_v6, %v3972_v25 }
 0x14a   : > { %v1188_v35 = vadd.f32 %v1118_v24, %v912_v33 }
 0x14b   : > { %v1396_v30 = vpop.f32.mrf.mxu0  ;;  %2925 = vmatmul.msk.f32.gmra.mxu1 %vm237_vm0, %v2987_v31 }
 0x14c   : > { %v4217_v0 = vadd.f32 %v1393_v8, %v1188_v35  ;;  %2957 = vmatmul.msk.f32.gmra.mxu2 %vm237_vm0, %v686_v34  ;;  %v3054_v8 = vld [vmem:[%s3558_s19 + $0x189] sm:$0xff] }
 0x14d   : > { %3021 = vmatmul.msk.f32.gmra.mxu3 %vm237_vm0, %v2989_v20 }
 0x14e   : > { %3085 = vmatmul.msk.f32.gmra.mxu0 %vm237_vm0, %v3053_v14 }
 0x14f   : > { %v845_v5 = vpop.f32.mrf.mxu2 }
 0x150   : > { %v913_v18 = vadd.f32 %v845_v5, %v603_v44  ;;  %v1121_v15 = vpop.f32.mrf.mxu3  ;;  %v605_v28 = vpop.f32.mrf.mxu1 }
 0x151   : > { %v606_v25 = vadd.f32 %v605_v28, %v3994_v51 }
 0x152   : > { %v1189_v40 = vadd.f32 %v1121_v15, %v913_v18 }
 0x153   : > { %v1399_v33 = vpop.f32.mrf.mxu0  ;;  %2926 = vmatmul.msk.f32.gmra.mxu1 %vm237_vm0, %v2988_v16 }
 0x154   : > { %v4227_v24 = vadd.f32 %v1396_v30, %v1189_v40  ;;  %2958 = vmatmul.msk.f32.gmra.mxu2 %vm237_vm0, %v687_v12 }
 0x155   : > { %3022 = vmatmul.msk.f32.gmra.mxu3 %vm237_vm0, %v2990_v47 }
 0x156   : > { %3086 = vmatmul.msk.f32.gmra.mxu0 %vm237_vm0, %v3054_v8 }
 0x157   : > { %v848_v31 = vpop.f32.mrf.mxu2 }
 0x158   : > { %v914_v6 = vadd.f32 %v848_v31, %v606_v25  ;;  %v1124_v34 = vpop.f32.mrf.mxu3  ;;  %v608_v35 = vpop.f32.mrf.mxu1 }
 0x159   : > { %v609_v51 = vadd.f32 %v608_v35, %v3846_v4 }
 0x15a   : > { %v1190_v20 = vadd.f32 %v1124_v34, %v914_v6 }
 0x15b   : > { %v1402_v14 = vpop.f32.mrf.mxu0  ;;  %3119 = vmatmul.msk.f32.vlgmr.msra.gmra.mxu1 %vm237_vm0, %v3747_v52 }
 0x15c   : > { %v4234_v44 = vadd.f32 %v1399_v33, %v1190_v20  ;;  %3183 = vmatmul.msk.f32.vlgmr.msra.gmra.mxu2 %vm237_vm0, %v3750_v53 }
 0x15d   : > { %3247 = vmatmul.msk.f32.vlgmr.msra.gmra.mxu3 %vm237_vm0, %v3650_v29 }
 0x15e   : > { %3311 = vmatmul.msk.f32.vlgmr.msra.gmra.mxu0 %vm237_vm0, %v3773_v56 }
 0x15f   : > { %v851_v16 = vpop.f32.mrf.mxu2 }
 0x160   : > { %v915_v30 = vadd.f32 %v851_v16, %v609_v51  ;;  %v1127_v5 = vpop.f32.mrf.mxu3  ;;  %v611_v18 = vpop.f32.mrf.mxu1 }
 0x161   : > { %v612_v29 = vadd.f32 %v611_v18, %v3868_v13 }
 0x162   : > { %v1191_v15 = vadd.f32 %v1127_v5, %v915_v30 }
 0x163   : > { %v1405_v28 = vpop.f32.mrf.mxu0  ;;  %3120 = vmatmul.msk.f32.gmra.mxu1 %vm237_vm0, %v3760_v54 }
 0x164   : > { %v4245_v12 = vadd.f32 %v1402_v14, %v1191_v15  ;;  %3184 = vmatmul.msk.f32.gmra.mxu2 %vm237_vm0, %v3763_v55  ;;  %v3219_v14 = vld [vmem:[%s3558_s19 + $0x61] sm:$0xff]  ;;  %v3220_v15 = vld [vmem:[%s3558_s19 + $0x69] sm:$0xff] }
 0x165   : > { %3248 = vmatmul.msk.f32.gmra.mxu3 %vm237_vm0, %v3679_v36 }
 0x166   : > { %3312 = vmatmul.msk.f32.gmra.mxu0 %vm237_vm0, %v3787_v58 }
 0x167   : > { %v854_v52 = vpop.f32.mrf.mxu2 }
 0x168   : > { %v916_v53 = vadd.f32 %v854_v52, %v612_v29  ;;  %v1130_v4 = vpop.f32.mrf.mxu3  ;;  %v614_v40 = vpop.f32.mrf.mxu1  ;;  %v4779_v52 = vld [vmem:[#allocation23_spill] sm:$0xff] }
 0x169   : > { %v615_v36 = vadd.f32 %v614_v40, %v3890_v22 }
 0x16a   : > { %v1192_v47 = vadd.f32 %v1130_v4, %v916_v53 }
 0x16b   : > { %v1408_v33 = vpop.f32.mrf.mxu0  ;;  %3121 = vmatmul.msk.f32.gmra.mxu1 %vm237_vm0, %v3773_v56 }
 0x16c   : > { %v4256_v8 = vadd.f32 %v1405_v28, %v1192_v47  ;;  %3185 = vmatmul.msk.f32.gmra.mxu2 %vm237_vm0, %v3776_v57 }
 0x16d   : > { %3249 = vmatmul.msk.f32.gmra.mxu3 %vm237_vm0, %v3702_v41 }
 0x16e   : > { %3313 = vmatmul.msk.f32.gmra.mxu0 %vm237_vm0, %v3801_v60 }
 0x16f   : > { %v857_v54 = vpop.f32.mrf.mxu2 }
 0x170   : > { %v917_v55 = vadd.f32 %v857_v54, %v615_v36  ;;  %v1133_v13 = vpop.f32.mrf.mxu3  ;;  %v617_v25 = vpop.f32.mrf.mxu1  ;;  %v3221_v54 = vld [vmem:[%s3558_s19 + $0x79] sm:$0xff] }
 0x171   : > { %v618_v41 = vadd.f32 %v617_v25, %v3912_v26  ;;  %v4781_v25 = vld [vmem:[#allocation11_spill] sm:$0xff] }
 0x172   : > { %v1193_v31 = vadd.f32 %v1133_v13, %v917_v55 }
 0x173   : > { %v1411_v6 = vpop.f32.mrf.mxu0  ;;  %3122 = vmatmul.msk.f32.gmra.mxu1 %vm237_vm0, %v3787_v58 }
 0x174   : > { %v4267_v34 = vadd.f32 %v1408_v33, %v1193_v31  ;;  %3186 = vmatmul.msk.f32.gmra.mxu2 %vm237_vm0, %v3790_v59  ;;  %v4782_v31 = vld [vmem:[#allocation27_spill] sm:$0xff] }
 0x175   : > { %3250 = vmatmul.msk.f32.gmra.mxu3 %vm237_vm0, %v3722_v45  ;;  %v4776_v45 = vld [vmem:[#allocation19_spill] sm:$0xff] }
 0x176   : > { %3314 = vmatmul.msk.f32.gmra.mxu0 %vm237_vm0, %v3815_v62 }
 0x177   : > { %v860_v56 = vpop.f32.mrf.mxu2 }
 0x178   : > { %v918_v57 = vadd.f32 %v860_v56, %v618_v41  ;;  %v1136_v22 = vpop.f32.mrf.mxu3  ;;  %v620_v35 = vpop.f32.mrf.mxu1 }
 0x179   : > { %v621_v59 = vadd.f32 %v620_v35, %v4776_v45  ;;  %v4784_v45 = vld [vmem:[#allocation14_spill] sm:$0xff] }
 0x17a   : > { %v1194_v20 = vadd.f32 %v1136_v22, %v918_v57 }
 0x17b   : > { %v1414_v51 = vpop.f32.mrf.mxu0  ;;  %3123 = vmatmul.msk.f32.gmra.mxu1 %vm237_vm0, %v3801_v60  ;;  %v4777_v60 = vld [vmem:[#allocation5_spill] sm:$0xff] }
 0x17c   : > { %v4279_v58 = vadd.f32 %v1411_v6, %v1194_v20  ;;  %3187 = vmatmul.msk.f32.gmra.mxu2 %vm237_vm0, %v3804_v61  ;;  %v4778_v61 = vld [vmem:[#allocation8_spill] sm:$0xff]  ;;  %v3222_v20 = vld [vmem:[%s3558_s19 + $0x81] sm:$0xff] }
 0x17d   : > { %3251 = vmatmul.msk.f32.gmra.mxu3 %vm237_vm0, %v3219_v14 }
 0x17e   : > { %3315 = vmatmul.msk.f32.gmra.mxu0 %vm237_vm0, %v3831_v1 }
 0x17f   : > { %v863_v26 = vpop.f32.mrf.mxu2 }
 0x180   : > { %v919_v16 = vadd.f32 %v863_v26, %v621_v59  ;;  %v1139_v30 = vpop.f32.mrf.mxu3  ;;  %v623_v5 = vpop.f32.mrf.mxu1  ;;  %v4785_v59 = vld [vmem:[#allocation30_spill] sm:$0xff] }
 0x181   : > { %v624_v53 = vadd.f32 %v623_v5, %v4779_v52 }
 0x182   : > { %v1195_v18 = vadd.f32 %v1139_v30, %v919_v16 }
 0x183   : > { %v1417_v28 = vpop.f32.mrf.mxu0  ;;  %3124 = vmatmul.msk.f32.gmra.mxu1 %vm237_vm0, %v3815_v62  ;;  %v4780_v62 = vld [vmem:[#allocation6_spill] sm:$0xff] }
 0x184   : > { %v4290_v29 = vadd.f32 %v1414_v51, %v1195_v18  ;;  %3188 = vmatmul.msk.f32.gmra.mxu2 %vm237_vm0, %v4777_v60 }
 0x185   : > { %3252 = vmatmul.msk.f32.gmra.mxu3 %vm237_vm0, %v3220_v15 }
 0x186   : > { %3316 = vmatmul.msk.f32.gmra.mxu0 %vm237_vm0, %v4778_v61 }
 0x187   : > { %v866_v4 = vpop.f32.mrf.mxu2 }
 0x188   : > { %v920_v40 = vadd.f32 %v866_v4, %v624_v53  ;;  %v1142_v47 = vpop.f32.mrf.mxu3  ;;  %v626_v33 = vpop.f32.mrf.mxu1  ;;  %v4787_v53 = vld [vmem:[#allocation17_spill] sm:$0xff]  ;;  %v4788_v4 = vld [vmem:[#allocation7_spill] sm:$0xff] }
 0x189   : > { %v627_v6 = vadd.f32 %v626_v33, %v4782_v31 }
 0x18a   : > { %v1196_v36 = vadd.f32 %v1142_v47, %v920_v40 }
 0x18b   : > { %v1420_v55 = vpop.f32.mrf.mxu0  ;;  %3125 = vmatmul.msk.f32.gmra.mxu1 %vm237_vm0, %v3831_v1  ;;  %v4783_v1 = vld [vmem:[#allocation9_spill] sm:$0xff] }
 0x18c   : > { %v4301_v13 = vadd.f32 %v1417_v28, %v1196_v36  ;;  %3189 = vmatmul.msk.f32.gmra.mxu2 %vm237_vm0, %v4780_v62  ;;  %v3223_v28 = vld [vmem:[%s3558_s19 + $0x91] sm:$0xff]  ;;  %v3224_v62 = vld [vmem:[%s3558_s19 + $0x99] sm:$0xff] }
 0x18d   : > { %3253 = vmatmul.msk.f32.gmra.mxu3 %vm237_vm0, %v3221_v54 }
 0x18e   : > { %3317 = vmatmul.msk.f32.gmra.mxu0 %vm237_vm0, %v4781_v25 }
 0x18f   : > { %v869_v41 = vpop.f32.mrf.mxu2 }
 0x190   : > { %v921_v56 = vadd.f32 %v869_v41, %v627_v6  ;;  %v1145_v57 = vpop.f32.mrf.mxu3  ;;  %v629_v22 = vpop.f32.mrf.mxu1  ;;  %v4790_v41 = vld [vmem:[#allocation21_spill] sm:$0xff] }
 0x191   : > { %v630_v26 = vadd.f32 %v629_v22, %v4785_v59  ;;  %v3225_v59 = vld [vmem:[%s3558_s19 + $0xa9] sm:$0xff] }
 0x192   : > { %v1197_v35 = vadd.f32 %v1145_v57, %v921_v56  ;;  %v4791_v56 = vld [vmem:[#allocation10_spill] sm:$0xff] }
 0x193   : > { %v1423_v14 = vpop.f32.mrf.mxu0  ;;  %3126 = vmatmul.msk.f32.gmra.mxu1 %vm237_vm0, %v4778_v61  ;;  %v4786_v61 = vld [vmem:[#allocation12_spill] sm:$0xff] }
 0x194   : > { %v4312_v51 = vadd.f32 %v1420_v55, %v1197_v35  ;;  %3190 = vmatmul.msk.f32.gmra.mxu2 %vm237_vm0, %v4783_v1 }
 0x195   : > { %3254 = vmatmul.msk.f32.gmra.mxu3 %vm237_vm0, %v3222_v20 }
 0x196   : > { %3318 = vmatmul.msk.f32.gmra.mxu0 %vm237_vm0, %v4784_v45 }
 0x197   : > { %v872_v16 = vpop.f32.mrf.mxu2 }
 0x198   : > { %v922_v30 = vadd.f32 %v872_v16, %v630_v26  ;;  %v1148_v5 = vpop.f32.mrf.mxu3  ;;  %v632_v18 = vpop.f32.mrf.mxu1 }
 0x199   : > { %v633_v40 = vadd.f32 %v632_v18, %v4788_v4 }
 0x19a   : > { %v1198_v15 = vadd.f32 %v1148_v5, %v922_v30  ;;  %v4793_v30 = vld [vmem:[#allocation25_spill] sm:$0xff] }
 0x19b   : > { %v1426_v60 = vpop.f32.mrf.mxu0  ;;  %3127 = vmatmul.msk.f32.gmra.mxu1 %vm237_vm0, %v4781_v25  ;;  %v4789_v25 = vld [vmem:[#allocation15_spill] sm:$0xff]  ;;  %v4794_v5 = vld [vmem:[#allocation13_spill] sm:$0xff] }
 0x19c   : > { %v4323_v52 = vadd.f32 %v1423_v14, %v1198_v15  ;;  %3191 = vmatmul.msk.f32.gmra.mxu2 %vm237_vm0, %v4786_v61 }
 0x19d   : > { %3255 = vmatmul.msk.f32.gmra.mxu3 %vm237_vm0, %v3223_v28 }
 0x19e   : > { %3319 = vmatmul.msk.f32.gmra.mxu0 %vm237_vm0, %v4787_v53 }
 0x19f   : > { %v875_v47 = vpop.f32.mrf.mxu2 }
 0x1a0   : > { %v923_v33 = vadd.f32 %v875_v47, %v633_v40  ;;  %v1151_v36 = vpop.f32.mrf.mxu3  ;;  %v635_v54 = vpop.f32.mrf.mxu1  ;;  %v3226_v40 = vld [vmem:[%s3558_s19 + $0xb1] sm:$0xff] }
 0x1a1   : > { %v636_v57 = vadd.f32 %v635_v54, %v4791_v56  ;;  %v4797_v54 = vld [vmem:[#allocation16_spill] sm:$0xff] }
 0x1a2   : > { %v1199_v55 = vadd.f32 %v1151_v36, %v923_v33  ;;  %v4796_v36 = vld [vmem:[#allocation29_spill] sm:$0xff] }
 0x1a3   : > { %v1429_v31 = vpop.f32.mrf.mxu0  ;;  %3128 = vmatmul.msk.f32.gmra.mxu1 %vm237_vm0, %v4784_v45  ;;  %v4792_v45 = vld [vmem:[#allocation18_spill] sm:$0xff] }
 0x1a4   : > { %v4334_v6 = vadd.f32 %v1426_v60, %v1199_v55  ;;  %3192 = vmatmul.msk.f32.gmra.mxu2 %vm237_vm0, %v4789_v25 }
 0x1a5   : > { %3256 = vmatmul.msk.f32.gmra.mxu3 %vm237_vm0, %v3224_v62 }
 0x1a6   : > { %3320 = vmatmul.msk.f32.gmra.mxu0 %vm237_vm0, %v4790_v41 }
 0x1a7   : > { %v878_v22 = vpop.f32.mrf.mxu2 }
 0x1a8   : > { %v924_v35 = vadd.f32 %v878_v22, %v636_v57  ;;  %v1154_v20 = vpop.f32.mrf.mxu3  ;;  %v638_v14 = vpop.f32.mrf.mxu1  ;;  %v3227_v22 = vld [vmem:[%s3558_s19 + $0xc1] sm:$0xff] }
 0x1a9   : > { %v639_v18 = vadd.f32 %v638_v14, %v4794_v5  ;;  %v4799_v14 = vld [vmem:[#allocation32_spill] sm:$0xff] }
 0x1aa   : > { %v1200_v1 = vadd.f32 %v1154_v20, %v924_v35 }
 0x1ab   : > { %v1432_v26 = vpop.f32.mrf.mxu0  ;;  %3129 = vmatmul.msk.f32.gmra.mxu1 %vm237_vm0, %v4787_v53  ;;  %v4795_v53 = vld [vmem:[#allocation22_spill] sm:$0xff] }
 0x1ac   : > { %v4345_v16 = vadd.f32 %v1429_v31, %v1200_v1  ;;  %3193 = vmatmul.msk.f32.gmra.mxu2 %vm237_vm0, %v4792_v45  ;;  %v4800_v1 = vld [vmem:[#allocation20_spill] sm:$0xff] }
 0x1ad   : > { %3257 = vmatmul.msk.f32.gmra.mxu3 %vm237_vm0, %v3225_v59 }
 0x1ae   : > { %3321 = vmatmul.msk.f32.gmra.mxu0 %vm237_vm0, %v4793_v30 }
 0x1af   : > { %v881_v15 = vpop.f32.mrf.mxu2 }
 0x1b0   : > { %v925_v28 = vadd.f32 %v881_v15, %v639_v18  ;;  %v1157_v60 = vpop.f32.mrf.mxu3  ;;  %v641_v61 = vpop.f32.mrf.mxu1 }
 0x1b1   : > { %v642_v55 = vadd.f32 %v641_v61, %v4797_v54 }
 0x1b2   : > { %v1201_v4 = vadd.f32 %v1157_v60, %v925_v28  ;;  %v3228_v28 = vld [vmem:[%s3558_s19 + $0xc9] sm:$0xff] }
 0x1b3   : > { %v1435_v47 = vpop.f32.mrf.mxu0  ;;  %3130 = vmatmul.msk.f32.gmra.mxu1 %vm237_vm0, %v4790_v41  ;;  %v4798_v41 = vld [vmem:[#allocation26_spill] sm:$0xff] }
 0x1b4   : > { %v4356_v33 = vadd.f32 %v1432_v26, %v1201_v4  ;;  %3194 = vmatmul.msk.f32.gmra.mxu2 %vm237_vm0, %v4795_v53 }
 0x1b5   : > { %3258 = vmatmul.msk.f32.gmra.mxu3 %vm237_vm0, %v3226_v40 }
 0x1b6   : > { %3322 = vmatmul.msk.f32.gmra.mxu0 %vm237_vm0, %v4796_v36 }
 0x1b7   : > { %v884_v62 = vpop.f32.mrf.mxu2 }
 0x1b8   : > { %v926_v31 = vadd.f32 %v884_v62, %v642_v55  ;;  %v1160_v25 = vpop.f32.mrf.mxu3  ;;  %v644_v56 = vpop.f32.mrf.mxu1  ;;  %v3229_v62 = vld [vmem:[%s3558_s19 + $0xd9] sm:$0xff] }
 0x1b9   : > { %v645_v59 = vadd.f32 %v644_v56, %v4800_v1  ;;  %v3230_v1 = vld [vmem:[%s3558_s19 + $0xe1] sm:$0xff] }
 0x1ba   : > { %v1202_v57 = vadd.f32 %v1160_v25, %v926_v31 }
 0x1bb   : > { %v1438_v35 = vpop.f32.mrf.mxu0  ;;  %3131 = vmatmul.msk.f32.gmra.mxu1 %vm237_vm0, %v4793_v30  ;;  %v4801_v30 = vld [vmem:[#allocation24_spill] sm:$0xff] }
 0x1bc   : > { %v4367_v20 = vadd.f32 %v1435_v47, %v1202_v57  ;;  %3195 = vmatmul.msk.f32.gmra.mxu2 %vm237_vm0, %v4798_v41 }
 0x1bd   : > { %3259 = vmatmul.msk.f32.gmra.mxu3 %vm237_vm0, %v3227_v22 }
 0x1be   : > { %3323 = vmatmul.msk.f32.gmra.mxu0 %vm237_vm0, %v4799_v14 }
 0x1bf   : > { %v887_v26 = vpop.f32.mrf.mxu2 }
 0x1c0   : > { %v927_v45 = vadd.f32 %v887_v26, %v645_v59  ;;  %v1163_v5 = vpop.f32.mrf.mxu3  ;;  %v647_v18 = vpop.f32.mrf.mxu1 }
 0x1c1   : > { %v648_v4 = vadd.f32 %v647_v18, %v4801_v30 }
 0x1c2   : > { %v1203_v15 = vadd.f32 %v1163_v5, %v927_v45 }
 0x1c3   : > { %v1441_v60 = vpop.f32.mrf.mxu0  ;;  %3132 = vmatmul.msk.f32.gmra.mxu1 %vm237_vm0, %v4796_v36 }
 0x1c4   : > { %v4378_v61 = vadd.f32 %v1438_v35, %v1203_v15  ;;  %3196 = vmatmul.msk.f32.gmra.mxu2 %vm237_vm0, %v4000_v49  ;;  %v4802_v49 = vld [vmem:[#allocation28_spill] sm:$0xff] }
 0x1c5   : > { %3260 = vmatmul.msk.f32.gmra.mxu3 %vm237_vm0, %v3228_v28 }
 0x1c6   : > { %3324 = vmatmul.msk.f32.gmra.mxu0 %vm237_vm0, %v4032_v9 }
 0x1c7   : > { %v890_v40 = vpop.f32.mrf.mxu2 }
 0x1c8   : > { %v928_v47 = vadd.f32 %v890_v40, %v648_v4  ;;  %v1166_v53 = vpop.f32.mrf.mxu3  ;;  %v650_v54 = vpop.f32.mrf.mxu1 }
 0x1c9   : > { %v651_v36 = vadd.f32 %v650_v54, %v4802_v49  ;;  %v4431_v49 = vld [vmem:[%s4712_s2 + $0x1] ss:$0 sm:$0xff] }
 0x1ca   : > { %v1204_v55 = vadd.f32 %v1166_v53, %v928_v47 }
 0x1cb   : > { %v1444_v31 = vpop.f32.mrf.mxu0  ;;  %3133 = vmatmul.msk.f32.gmra.mxu1 %vm237_vm0, %v4799_v14 }
 0x1cc   : > { %v4389_v25 = vadd.f32 %v1441_v60, %v1204_v55  ;;  %3197 = vmatmul.msk.f32.gmra.mxu2 %vm237_vm0, %v4020_v2  ;;  %v4803_v2 = vld [vmem:[#allocation31_spill] sm:$0xff] }
 0x1cd   : > { %3261 = vmatmul.msk.f32.gmra.mxu3 %vm237_vm0, %v3229_v62  ;;  %v3231_v60 = vld [vmem:[%s3558_s19 + $0xf1] sm:$0xff]  ;;  %v3232_v62 = vld [vmem:[%s3558_s19 + $0xf9] sm:$0xff] }
 0x1ce   : > { %3325 = vmatmul.msk.f32.gmra.mxu0 %vm237_vm0, %v4049_v38 }
 0x1cf   : > { %v893_v56 = vpop.f32.mrf.mxu2 }
 0x1d0   : > { %v929_v57 = vadd.f32 %v893_v56, %v651_v36  ;;  %v1169_v22 = vpop.f32.mrf.mxu3  ;;  %v653_v35 = vpop.f32.mrf.mxu1  ;;  %v4805_v36 = vld [vmem:[#allocation34_spill] sm:$0xff] }
 0x1d1   : > { %v654_v14 = vadd.f32 %v653_v35, %v4803_v2  ;;  %v3233_v2 = vld [vmem:[%s3558_s19 + $0x109] sm:$0xff] }
 0x1d2   : > { %v1205_v41 = vadd.f32 %v1169_v22, %v929_v57 }
 0x1d3   : > { %v1447_v59 = vpop.f32.mrf.mxu0  ;;  %3134 = vmatmul.msk.f32.gmra.mxu1 %vm237_vm0, %v4032_v9 }
 0x1d4   : > { %v4400_v26 = vadd.f32 %v1444_v31, %v1205_v41  ;;  %3198 = vmatmul.msk.f32.gmra.mxu2 %vm237_vm0, %v4035_v63  ;;  %v4804_v63 = vld [vmem:[#allocation33_spill] sm:$0xff] }
 0x1d5   : > { %3262 = vmatmul.msk.f32.gmra.mxu3 %vm237_vm0, %v3230_v1 }
 0x1d6   : > { %3326 = vmatmul.msk.f32.gmra.mxu0 %vm237_vm0, %v4066_v3 }
 0x1d7   : > { %v896_v45 = vpop.f32.mrf.mxu2 }
 0x1d8   : > { %v930_v5 = vadd.f32 %v896_v45, %v654_v14  ;;  %v1172_v18 = vpop.f32.mrf.mxu3  ;;  %v1629_v15 = vpop.f32.mrf.mxu1 }
 0x1d9   : > { %v1725_v4 = vadd.f32 %v1629_v15, %v4804_v63 }
 0x1da   : > { %v1206_v28 = vadd.f32 %v1172_v18, %v930_v5  ;;  %v4806_v18 = vld [vmem:[#allocation35_spill] sm:$0xff] }
 0x1db   : > { %v2455_v30 = vpop.f32.mrf.mxu0  ;;  %3135 = vmatmul.msk.f32.gmra.mxu1 %vm237_vm0, %v4049_v38  ;;  %v4424_v38 = vld [vmem:[%s4712_s2] ss:$0 sm:$0xff] }
 0x1dc   : > { %v4411_v9 = vadd.f32 %v1447_v59, %v1206_v28  ;;  %3199 = vmatmul.msk.f32.gmra.mxu2 %vm237_vm0, %v4052_v7 }
 0x1dd   : > { %3263 = vmatmul.msk.f32.gmra.mxu3 %vm237_vm0, %v3231_v60 }
 0x1de   : > { %3327 = vmatmul.msk.f32.gmra.mxu0 %vm237_vm0, %v4083_v11 }
 0x1df   : > { %v1905_v40 = vpop.f32.mrf.mxu2 }
 0x1e0   : > { %v2001_v47 = vadd.f32 %v1905_v40, %v1725_v4  ;;  %v2180_v53 = vpop.f32.mrf.mxu3  ;;  %v1632_v54 = vpop.f32.mrf.mxu1 }
 0x1e1   : > { %v1726_v56 = vadd.f32 %v1632_v54, %v4805_v36 }
 0x1e2   : > { %v2276_v55 = vadd.f32 %v2180_v53, %v2001_v47  ;;  %v3234_v47 = vld [vmem:[%s3558_s19 + $0x111] sm:$0xff] }
 0x1e3   : > { %v2458_v7 = vpop.f32.mrf.mxu0  ;;  %3136 = vmatmul.msk.f32.gmra.mxu1 %vm237_vm0, %v4066_v3 }
 0x1e4   : > { %v2551_v31 = vadd.f32 %v2455_v30, %v2276_v55  ;;  %3200 = vmatmul.msk.f32.gmra.mxu2 %vm237_vm0, %v4069_v48 }
 0x1e5   : > { %3264 = vmatmul.msk.f32.gmra.mxu3 %vm237_vm0, %v3232_v62  ;;  %v4807_v62 = vld [vmem:[#allocation36_spill] sm:$0xff] }
 0x1e6   : > { %3328 = vmatmul.msk.f32.gmra.mxu0 %vm237_vm0, %v4100_v21  ;;  %v2586_v57 = vmul.f32 %v4424_v38, %v2551_v31 }
 0x1e7   : > { %v1908_v22 = vpop.f32.mrf.mxu2 }
 0x1e8   : > { %v2619_v35 = vadd.f32 %v4431_v49, %v2586_v57  ;;  %v2002_v41 = vadd.f32 %v1908_v22, %v1726_v56  ;;  %v2183_v1 = vpop.f32.mrf.mxu3  ;;  %v1635_v3 = vpop.f32.mrf.mxu1 }
 0x1e9   : > { %v1727_v15 = vadd.f32 %v1635_v3, %v4806_v18 }
 0x1ea   : > { %vm2651_vm1 = vcmp.gt.f32.partialorder %v2619_v35, 0.0  ;;  %v2683_v59 = vmul.f32 0.1, %v2619_v35  ;;  %v2277_v48 = vadd.f32 %v2183_v1, %v2002_v41  ;;  %v3235_v41 = vld [vmem:[%s3558_s19 + $0x121] sm:$0xff] }
 0x1eb   : > { %v2461_v14 = vpop.f32.mrf.mxu0  ;;  %3137 = vmatmul.msk.f32.gmra.mxu1 %vm237_vm0, %v4083_v11 }
 0x1ec   : > { %v2715_v45 = vsel %vm2651_vm1, %v2619_v35, %v2683_v59  ;;  %v2552_v5 = vadd.f32 %v2458_v7, %v2277_v48  ;;  %3201 = vmatmul.msk.f32.gmra.mxu2 %vm237_vm0, %v4086_v19  ;;  %v4808_v59 = vld [vmem:[#allocation37_spill] sm:$0xff] }
 0x1ed   : > { %2747 = vst [vmem:[%s4450_s9] sm:$0xff] %v2715_v45  ;;  %3265 = vmatmul.msk.f32.gmra.mxu3 %vm237_vm0, %v3233_v2 }
 0x1ee   : > { %3329 = vmatmul.msk.f32.gmra.mxu0 %vm237_vm0, %v4117_v37  ;;  %v2587_v28 = vmul.f32 %v4424_v38, %v2552_v5 }
 0x1ef   : > { %v1911_v60 = vpop.f32.mrf.mxu2 }
 0x1f0   : > { %v2620_v11 = vadd.f32 %v4431_v49, %v2587_v28  ;;  %v2003_v30 = vadd.f32 %v1911_v60, %v1727_v15  ;;  %v2186_v63 = vpop.f32.mrf.mxu3  ;;  %v1638_v19 = vpop.f32.mrf.mxu1  ;;  %v3108_v15 = vld [vmem:[%s3558_s19 + $0x112] sm:$0xff] }
 0x1f1   : > { %v1728_v7 = vadd.f32 %v1638_v19, %v4807_v62  ;;  %v4809_v19 = vld [vmem:[#allocation38_spill] sm:$0xff] }
 0x1f2   : > { %vm2652_vm2 = vcmp.gt.f32.partialorder %v2620_v11, 0.0  ;;  %v2684_v4 = vmul.f32 0.1, %v2620_v11  ;;  %v2278_v40 = vadd.f32 %v2186_v63, %v2003_v30 }
 0x1f3   : > { %v2464_v53 = vpop.f32.mrf.mxu0  ;;  %3138 = vmatmul.msk.f32.gmra.mxu1 %vm237_vm0, %v4100_v21 }
 0x1f4   : > { %v2716_v54 = vsel %vm2652_vm2, %v2620_v11, %v2684_v4  ;;  %v2553_v55 = vadd.f32 %v2461_v14, %v2278_v40  ;;  %3202 = vmatmul.msk.f32.gmra.mxu2 %vm237_vm0, %v4103_v23  ;;  %v3236_v11 = vld [vmem:[%s3558_s19 + $0x129] sm:$0xff] }
 0x1f5   : > { %2748 = vst [vmem:[%s4450_s9 + $0x8] sm:$0xff] %v2716_v54  ;;  %3266 = vmatmul.msk.f32.gmra.mxu3 %vm237_vm0, %v3234_v47 }
 0x1f6   : > { %3330 = vmatmul.msk.f32.gmra.mxu0 %vm237_vm0, %v4134_v50  ;;  %v2588_v31 = vmul.f32 %v4424_v38, %v2553_v55 }
 0x1f7   : > { %v1914_v36 = vpop.f32.mrf.mxu2 }
 0x1f8   : > { %v2621_v56 = vadd.f32 %v4431_v49, %v2588_v31  ;;  %v2004_v57 = vadd.f32 %v1914_v36, %v1728_v7  ;;  %v2189_v22 = vpop.f32.mrf.mxu3  ;;  %v1641_v21 = vpop.f32.mrf.mxu1  ;;  %v3109_v7 = vld [vmem:[%s3558_s19 + $0x122] sm:$0xff]  ;;  %v3173_v31 = vld [vmem:[%s3558_s19 + $0x138] sm:$0xff] }
 0x1f9   : > { %v1729_v48 = vadd.f32 %v1641_v21, %v4808_v59 }
 0x1fa   : > { %vm2653_vm3 = vcmp.gt.f32.partialorder %v2621_v56, 0.0  ;;  %v2685_v35 = vmul.f32 0.1, %v2621_v56  ;;  %v2279_v23 = vadd.f32 %v2189_v22, %v2004_v57  ;;  %v3237_v57 = vld [vmem:[%s3558_s19 + $0x139] sm:$0xff] }
 0x1fb   : > { %v2467_v1 = vpop.f32.mrf.mxu0  ;;  %3139 = vmatmul.msk.f32.gmra.mxu1 %vm237_vm0, %v4117_v37 }
 0x1fc   : > { %v2717_v3 = vsel %vm2653_vm3, %v2621_v56, %v2685_v35  ;;  %v2554_v50 = vadd.f32 %v2464_v53, %v2279_v23  ;;  %3203 = vmatmul.msk.f32.gmra.mxu2 %vm237_vm0, %v4120_v27  ;;  %v3172_v27 = vld [vmem:[%s3558_s19 + $0x128] sm:$0xff]  ;;  %v4810_v23 = vld [vmem:[#allocation39_spill] sm:$0xff] }
 0x1fd   : > { %2749 = vst [vmem:[%s4450_s9 + $0x10] sm:$0xff] %v2717_v3  ;;  %3267 = vmatmul.msk.f32.gmra.mxu3 %vm237_vm0, %v3235_v41 }
 0x1fe   : > { %3331 = vmatmul.msk.f32.gmra.mxu0 %vm237_vm0, %v4148_v32  ;;  %v2589_v2 = vmul.f32 %v4424_v38, %v2554_v50 }
 0x1ff   : > { %v1917_v14 = vpop.f32.mrf.mxu2 }
 0x200   : > { %v2622_v45 = vadd.f32 %v4431_v49, %v2589_v2  ;;  %v2005_v5 = vadd.f32 %v1917_v14, %v1729_v48  ;;  %v2192_v37 = vpop.f32.mrf.mxu3  ;;  %v1644_v18 = vpop.f32.mrf.mxu1  ;;  %v3110_v14 = vld [vmem:[%s3558_s19 + $0x12a] sm:$0xff] }
 0x201   : > { %v1730_v4 = vadd.f32 %v1644_v18, %v4809_v19  ;;  %v3238_v18 = vld [vmem:[%s3558_s19 + $0x141] sm:$0xff] }
 0x202   : > { %vm2654_vm4 = vcmp.gt.f32.partialorder %v2622_v45, 0.0  ;;  %v2686_v28 = vmul.f32 0.1, %v2622_v45  ;;  %v2280_v60 = vadd.f32 %v2192_v37, %v2005_v5 }
 0x203   : > { %v2470_v30 = vpop.f32.mrf.mxu0  ;;  %3140 = vmatmul.msk.f32.gmra.mxu1 %vm237_vm0, %v3108_v15 }
 0x204   : > { %v2718_v32 = vsel %vm2654_vm4, %v2622_v45, %v2686_v28  ;;  %v2555_v63 = vadd.f32 %v2467_v1, %v2280_v60  ;;  %3204 = vmatmul.msk.f32.gmra.mxu2 %vm237_vm0, %v3172_v27  ;;  %v3174_v45 = vld [vmem:[%s3558_s19 + $0x140] sm:$0xff] }
 0x205   : > { %2750 = vst [vmem:[%s4450_s9 + $0x18] sm:$0xff] %v2718_v32  ;;  %3268 = vmatmul.msk.f32.gmra.mxu3 %vm237_vm0, %v3236_v11  ;;  %v3302_v27 = vld [vmem:[%s3558_s19 + $0x142] sm:$0xff]  ;;  %v4811_v11 = vld [vmem:[#allocation40_spill] sm:$0xff] }
 0x206   : > { %3332 = vmatmul.msk.f32.gmra.mxu0 %vm237_vm0, %v4162_v42  ;;  %v2590_v40 = vmul.f32 %v4424_v38, %v2555_v63  ;;  %v3301_v42 = vld [vmem:[%s3558_s19 + $0x13a] sm:$0xff] }
 0x207   : > { %v1920_v47 = vpop.f32.mrf.mxu2 }
 0x208   : > { %v2623_v53 = vadd.f32 %v4431_v49, %v2590_v40  ;;  %v2006_v54 = vadd.f32 %v1920_v47, %v1730_v4  ;;  %v2195_v55 = vpop.f32.mrf.mxu3  ;;  %v1647_v62 = vpop.f32.mrf.mxu1 }
 0x209   : > { %v1731_v41 = vadd.f32 %v1647_v62, %v4810_v23  ;;  %v3239_v62 = vld [vmem:[%s3558_s19 + $0x151] sm:$0xff] }
 0x20a   : > { %vm2655_vm5 = vcmp.gt.f32.partialorder %v2623_v53, 0.0  ;;  %v2687_v36 = vmul.f32 0.1, %v2623_v53  ;;  %v2281_v56 = vadd.f32 %v2195_v55, %v2006_v54 }
 0x20b   : > { %v2473_v22 = vpop.f32.mrf.mxu0  ;;  %3141 = vmatmul.msk.f32.gmra.mxu1 %vm237_vm0, %v3109_v7 }
 0x20c   : > { %v2719_v21 = vsel %vm2655_vm5, %v2623_v53, %v2687_v36  ;;  %v2556_v35 = vadd.f32 %v2470_v30, %v2281_v56  ;;  %3205 = vmatmul.msk.f32.gmra.mxu2 %vm237_vm0, %v3173_v31  ;;  %v3175_v53 = vld [vmem:[%s3558_s19 + $0x150] sm:$0xff] }
 0x20d   : > { %2751 = vst [vmem:[%s4450_s9 + $0x20] sm:$0xff] %v2719_v21  ;;  %3269 = vmatmul.msk.f32.gmra.mxu3 %vm237_vm0, %v3237_v57  ;;  %v3303_v31 = vld [vmem:[%s3558_s19 + $0x152] sm:$0xff] }
 0x20e   : > { %3333 = vmatmul.msk.f32.gmra.mxu0 %vm237_vm0, %v3301_v42  ;;  %v2591_v1 = vmul.f32 %v4424_v38, %v2556_v35 }
 0x20f   : > { %v1923_v3 = vpop.f32.mrf.mxu2 }
 0x210   : > { %v2624_v50 = vadd.f32 %v4431_v49, %v2591_v1  ;;  %v2007_v59 = vadd.f32 %v1923_v3, %v1731_v41  ;;  %v2198_v48 = vpop.f32.mrf.mxu3  ;;  %v1650_v2 = vpop.f32.mrf.mxu1  ;;  %v3176_v1 = vld [vmem:[%s3558_s19 + $0x158] sm:$0xff] }
 0x211   : > { %v1732_v30 = vadd.f32 %v1650_v2, %v4811_v11  ;;  %v3304_v2 = vld [vmem:[%s3558_s19 + $0x15a] sm:$0xff] }
 0x212   : > { %vm2656_vm6 = vcmp.gt.f32.partialorder %v2624_v50, 0.0  ;;  %v2688_v5 = vmul.f32 0.1, %v2624_v50  ;;  %v2282_v37 = vadd.f32 %v2198_v48, %v2007_v59  ;;  %v3240_v59 = vld [vmem:[%s3558_s19 + $0x159] sm:$0xff] }
 0x213   : > { %v2476_v15 = vpop.f32.mrf.mxu0  ;;  %3142 = vmatmul.msk.f32.gmra.mxu1 %vm237_vm0, %v3110_v14 }
 0x214   : > { %v2720_v28 = vsel %vm2656_vm6, %v2624_v50, %v2688_v5  ;;  %v2557_v60 = vadd.f32 %v2473_v22, %v2282_v37  ;;  %3206 = vmatmul.msk.f32.gmra.mxu2 %vm237_vm0, %v3174_v45 }
 0x215   : > { %2752 = vst [vmem:[%s4450_s9 + $0x28] sm:$0xff] %v2720_v28  ;;  %3270 = vmatmul.msk.f32.gmra.mxu3 %vm237_vm0, %v3238_v18 }
 0x216   : > { %3334 = vmatmul.msk.f32.gmra.mxu0 %vm237_vm0, %v3302_v27  ;;  %v2592_v32 = vmul.f32 %v4424_v38, %v2557_v60  ;;  %v3177_v60 = vld [vmem:[%s3558_s19 + $0x168] sm:$0xff] }
 0x217   : > { %v1926_v63 = vpop.f32.mrf.mxu2 }
 0x218   : > { %v2625_v19 = vadd.f32 %v4431_v49, %v2592_v32  ;;  %v2008_v4 = vadd.f32 %v1926_v63, %v1732_v30  ;;  %v2201_v40 = vpop.f32.mrf.mxu3  ;;  %v1653_v47 = vpop.f32.mrf.mxu1  ;;  %v3241_v32 = vld [vmem:[%s3558_s19 + $0x169] sm:$0xff] }
 0x219   : > { %v1733_v57 = vadd.f32 %v1653_v47, %v4165_v46 }
 0x21a   : > { %vm2657_vm7 = vcmp.gt.f32.partialorder %v2625_v19, 0.0  ;;  %v2689_v54 = vmul.f32 0.1, %v2625_v19  ;;  %v2283_v55 = vadd.f32 %v2201_v40, %v2008_v4 }
 0x21b   : > { %v2479_v7 = vpop.f32.mrf.mxu0  ;;  %3143 = vmatmul.msk.f32.gmra.mxu1 %vm237_vm0, %v3301_v42 }
 0x21c   : > { %v2721_v36 = vsel %vm2657_vm7, %v2625_v19, %v2689_v54  ;;  %v2558_v56 = vadd.f32 %v2476_v15, %v2283_v55  ;;  %3207 = vmatmul.msk.f32.gmra.mxu2 %vm237_vm0, %v3175_v53  ;;  %v3305_v19 = vld [vmem:[%s3558_s19 + $0x16a] sm:$0xff] }
 0x21d   : > { %2753 = vst [vmem:[%s4450_s9 + $0x30] sm:$0xff] %v2721_v36  ;;  %3271 = vmatmul.msk.f32.gmra.mxu3 %vm237_vm0, %v3239_v62 }
 0x21e   : > { %3335 = vmatmul.msk.f32.gmra.mxu0 %vm237_vm0, %v3303_v31  ;;  %v2593_v22 = vmul.f32 %v4424_v38, %v2558_v56 }
 0x21f   : > { %v1929_v21 = vpop.f32.mrf.mxu2 }
 0x220   : > { %v2626_v35 = vadd.f32 %v4431_v49, %v2593_v22  ;;  %v2009_v23 = vadd.f32 %v1929_v21, %v1733_v57  ;;  %v2204_v41 = vpop.f32.mrf.mxu3  ;;  %v1656_v42 = vpop.f32.mrf.mxu1  ;;  %v3242_v57 = vld [vmem:[%s3558_s19 + $0x171] sm:$0xff] }
 0x221   : > { %v1734_v46 = vadd.f32 %v1656_v42, %v4176_v10  ;;  %v3306_v21 = vld [vmem:[%s3558_s19 + $0x172] sm:$0xff] }
 0x222   : > { %vm2658_vm8 = vcmp.gt.f32.partialorder %v2626_v35, 0.0  ;;  %v2690_v3 = vmul.f32 0.1, %v2626_v35  ;;  %v2284_v50 = vadd.f32 %v2204_v41, %v2009_v23 }
 0x223   : > { %v2482_v48 = vpop.f32.mrf.mxu0  ;;  %3144 = vmatmul.msk.f32.gmra.mxu1 %vm237_vm0, %v3302_v27 }
 0x224   : > { %v2722_v14 = vsel %vm2658_vm8, %v2626_v35, %v2690_v3  ;;  %v2559_v45 = vadd.f32 %v2479_v7, %v2284_v50  ;;  %3208 = vmatmul.msk.f32.gmra.mxu2 %vm237_vm0, %v3176_v1 }
 0x225   : > { %2754 = vst [vmem:[%s4450_s9 + $0x38] sm:$0xff] %v2722_v14  ;;  %3272 = vmatmul.msk.f32.gmra.mxu3 %vm237_vm0, %v3240_v59 }
 0x226   : > { %3336 = vmatmul.msk.f32.gmra.mxu0 %vm237_vm0, %v3304_v2  ;;  %v2594_v5 = vmul.f32 %v4424_v38, %v2559_v45  ;;  %v3243_v45 = vld [vmem:[%s3558_s19 + $0x181] sm:$0xff] }
 0x227   : > { %v1932_v37 = vpop.f32.mrf.mxu2 }
 0x228   : > { %v2627_v18 = vadd.f32 %v4431_v49, %v2594_v5  ;;  %v2010_v15 = vadd.f32 %v1932_v37, %v1734_v46  ;;  %v2207_v28 = vpop.f32.mrf.mxu3  ;;  %v1659_v27 = vpop.f32.mrf.mxu1  ;;  %v3307_v5 = vld [vmem:[%s3558_s19 + $0x182] sm:$0xff] }
 0x229   : > { %v1735_v10 = vadd.f32 %v1659_v27, %v4186_v39 }
 0x22a   : > { %vm2659_vm9 = vcmp.gt.f32.partialorder %v2627_v18, 0.0  ;;  %v2691_v11 = vmul.f32 0.1, %v2627_v18  ;;  %v2285_v30 = vadd.f32 %v2207_v28, %v2010_v15 }
 0x22b   : > { %v2485_v63 = vpop.f32.mrf.mxu0  ;;  %3145 = vmatmul.msk.f32.gmra.mxu1 %vm237_vm0, %v3303_v31  ;;  %v3178_v31 = vld [vmem:[%s3558_s19 + $0x170] sm:$0xff] }
 0x22c   : > { %v2723_v4 = vsel %vm2659_vm9, %v2627_v18, %v2691_v11  ;;  %v2560_v40 = vadd.f32 %v2482_v48, %v2285_v30  ;;  %3209 = vmatmul.msk.f32.gmra.mxu2 %vm237_vm0, %v3177_v60  ;;  %v3179_v48 = vld [vmem:[%s3558_s19 + $0x180] sm:$0xff] }
 0x22d   : > { %2755 = vst [vmem:[%s4450_s9 + $0x40] sm:$0xff] %v2723_v4  ;;  %3273 = vmatmul.msk.f32.gmra.mxu3 %vm237_vm0, %v3241_v32  ;;  %v3180_v32 = vld [vmem:[%s3558_s19 + $0x188] sm:$0xff] }
 0x22e   : > { %3337 = vmatmul.msk.f32.gmra.mxu0 %vm237_vm0, %v3305_v19  ;;  %v2595_v47 = vmul.f32 %v4424_v38, %v2560_v40  ;;  %v3244_v4 = vld [vmem:[%s3558_s19 + $0x189] sm:$0xff] }
 0x22f   : > { %v1935_v53 = vpop.f32.mrf.mxu2 }
 0x230   : > { %v2628_v54 = vadd.f32 %v4431_v49, %v2595_v47  ;;  %v2011_v55 = vadd.f32 %v1935_v53, %v1735_v10  ;;  %v2210_v62 = vpop.f32.mrf.mxu3  ;;  %v1662_v7 = vpop.f32.mrf.mxu1  ;;  %v3308_v10 = vld [vmem:[%s3558_s19 + $0x18a] sm:$0xff] }
 0x231   : > { %v1736_v39 = vadd.f32 %v1662_v7, %v4196_v43 }
 0x232   : > { %vm2660_vm10 = vcmp.gt.f32.partialorder %v2628_v54, 0.0  ;;  %v2692_v36 = vmul.f32 0.1, %v2628_v54  ;;  %v2286_v56 = vadd.f32 %v2210_v62, %v2011_v55 }
 0x233   : > { %v2488_v22 = vpop.f32.mrf.mxu0  ;;  %3146 = vmatmul.msk.f32.gmra.mxu1 %vm237_vm0, %v3304_v2 }
 0x234   : > { %v2724_v35 = vsel %vm2660_vm10, %v2628_v54, %v2692_v36  ;;  %v2561_v23 = vadd.f32 %v2485_v63, %v2286_v56  ;;  %3210 = vmatmul.msk.f32.gmra.mxu2 %vm237_vm0, %v3178_v31  ;;  %v3181_v56 = vld [vmem:[%s3558_s19 + $0x198] sm:$0xff] }
 0x235   : > { %2756 = vst [vmem:[%s4450_s9 + $0x48] sm:$0xff] %v2724_v35  ;;  %3274 = vmatmul.msk.f32.gmra.mxu3 %vm237_vm0, %v3242_v57 }
 0x236   : > { %3338 = vmatmul.msk.f32.gmra.mxu0 %vm237_vm0, %v3306_v21  ;;  %v2596_v41 = vmul.f32 %v4424_v38, %v2561_v23  ;;  %v3309_v23 = vld [vmem:[%s3558_s19 + $0x19a] sm:$0xff] }
 0x237   : > { %v1938_v42 = vpop.f32.mrf.mxu2 }
 0x238   : > { %v2629_v1 = vadd.f32 %v4431_v49, %v2596_v41  ;;  %v2012_v3 = vadd.f32 %v1938_v42, %v1736_v39  ;;  %v2213_v50 = vpop.f32.mrf.mxu3  ;;  %v1665_v59 = vpop.f32.mrf.mxu1 }
 0x239   : > { %v1737_v43 = vadd.f32 %v1665_v59, %v4206_v17 }
 0x23a   : > { %vm2661_vm11 = vcmp.gt.f32.partialorder %v2629_v1, 0.0  ;;  %v2693_v2 = vmul.f32 0.1, %v2629_v1  ;;  %v2287_v14 = vadd.f32 %v2213_v50, %v2012_v3 }
 0x23b   : > { %v2491_v46 = vpop.f32.mrf.mxu0  ;;  %3147 = vmatmul.msk.f32.gmra.mxu1 %vm237_vm0, %v3305_v19 }
 0x23c   : > { %v2725_v37 = vsel %vm2661_vm11, %v2629_v1, %v2693_v2  ;;  %v2562_v18 = vadd.f32 %v2488_v22, %v2287_v14  ;;  %3211 = vmatmul.msk.f32.gmra.mxu2 %vm237_vm0, %v3179_v48  ;;  %v3182_v2 = vld [vmem:[%s3558_s19 + $0x1a0] sm:$0xff] }
 0x23d   : > { %2757 = vst [vmem:[%s4450_s9 + $0x50] sm:$0xff] %v2725_v37  ;;  %3275 = vmatmul.msk.f32.gmra.mxu3 %vm237_vm0, %v3243_v45  ;;  %v3310_v37 = vld [vmem:[%s3558_s19 + $0x1a2] sm:$0xff] }
 0x23e   : > { %3339 = vmatmul.msk.f32.gmra.mxu0 %vm237_vm0, %v3307_v5  ;;  %v2597_v15 = vmul.f32 %v4424_v38, %v2562_v18 }
 0x23f   : > { %v1941_v28 = vpop.f32.mrf.mxu2 }
 0x240   : > { %v2630_v27 = vadd.f32 %v4431_v49, %v2597_v15  ;;  %v2013_v60 = vadd.f32 %v1941_v28, %v1737_v43  ;;  %v2216_v11 = vpop.f32.mrf.mxu3  ;;  %v1668_v30 = vpop.f32.mrf.mxu1 }
 0x241   : > { %v1738_v17 = vadd.f32 %v1668_v30, %v4217_v0 }
 0x242   : > { %vm2662_vm12 = vcmp.gt.f32.partialorder %v2630_v27, 0.0  ;;  %v2694_v63 = vmul.f32 0.1, %v2630_v27  ;;  %v2288_v19 = vadd.f32 %v2216_v11, %v2013_v60 }
 0x243   : > { %v2494_v40 = vpop.f32.mrf.mxu0  ;;  %3148 = vmatmul.msk.f32.gmra.mxu1 %vm237_vm0, %v3306_v21  ;;  %v3245_v21 = vld [vmem:[%s3558_s19 + $0x199] sm:$0xff] }
 0x244   : > { %v2726_v47 = vsel %vm2662_vm12, %v2630_v27, %v2694_v63  ;;  %v2563_v53 = vadd.f32 %v2491_v46, %v2288_v19  ;;  %3212 = vmatmul.msk.f32.gmra.mxu2 %vm237_vm0, %v3180_v32  ;;  %v3246_v46 = vld [vmem:[%s3558_s19 + $0x1a1] sm:$0xff] }
 0x245   : > { %2758 = vst [vmem:[%s4450_s9 + $0x58] sm:$0xff] %v2726_v47  ;;  %3276 = vmatmul.msk.f32.gmra.mxu3 %vm237_vm0, %v3244_v4 }
 0x246   : > { %3340 = vmatmul.msk.f32.gmra.mxu0 %vm237_vm0, %v3308_v10  ;;  %v2598_v54 = vmul.f32 %v4424_v38, %v2563_v53 }
 0x247   : > { %v1944_v55 = vpop.f32.mrf.mxu2 }
 0x248   : > { %v2631_v62 = vadd.f32 %v4431_v49, %v2598_v54  ;;  %v2014_v7 = vadd.f32 %v1944_v55, %v1738_v17  ;;  %v2219_v31 = vpop.f32.mrf.mxu3  ;;  %v1671_v36 = vpop.f32.mrf.mxu1 }
 0x249   : > { %v1739_v0 = vadd.f32 %v1671_v36, %v4227_v24 }
 0x24a   : > { %vm2663_vm13 = vcmp.gt.f32.partialorder %v2631_v62, 0.0  ;;  %v2695_v57 = vmul.f32 0.1, %v2631_v62  ;;  %v2289_v22 = vadd.f32 %v2219_v31, %v2014_v7 }
 0x24b   : > { %v2497_v35 = vpop.f32.mrf.mxu0  ;;  %3149 = vmatmul.msk.f32.gmra.mxu1 %vm237_vm0, %v3307_v5 }
 0x24c   : > { %v2727_v39 = vsel %vm2663_vm13, %v2631_v62, %v2695_v57  ;;  %v2564_v41 = vadd.f32 %v2494_v40, %v2289_v22  ;;  %3213 = vmatmul.msk.f32.gmra.mxu2 %vm237_vm0, %v3181_v56 }
 0x24d   : > { %2759 = vst [vmem:[%s4450_s9 + $0x60] sm:$0xff] %v2727_v39  ;;  %3277 = vmatmul.msk.f32.gmra.mxu3 %vm237_vm0, %v3245_v21 }
 0x24e   : > { %3341 = vmatmul.msk.f32.gmra.mxu0 %vm237_vm0, %v3309_v23  ;;  %v2599_v42 = vmul.f32 %v4424_v38, %v2564_v41 }
 0x24f   : > { %v1947_v1 = vpop.f32.mrf.mxu2 }
 0x250   : > { %v2632_v3 = vadd.f32 %v4431_v49, %v2599_v42  ;;  %v2015_v50 = vadd.f32 %v1947_v1, %v1739_v0  ;;  %v2222_v59 = vpop.f32.mrf.mxu3  ;;  %v1674_v48 = vpop.f32.mrf.mxu1 }
 0x251   : > { %v1740_v24 = vadd.f32 %v1674_v48, %v4234_v44 }
 0x252   : > { %vm2664_vm14 = vcmp.gt.f32.partialorder %v2632_v3, 0.0  ;;  %v2696_v14 = vmul.f32 0.1, %v2632_v3  ;;  %v2290_v45 = vadd.f32 %v2222_v59, %v2015_v50 }
 0x253   : > { %v2500_v5 = vpop.f32.mrf.mxu0  ;;  %3150 = vmatmul.msk.f32.gmra.mxu1 %vm237_vm0, %v3308_v10 }
 0x254   : > { %v2728_v18 = vsel %vm2664_vm14, %v2632_v3, %v2696_v14  ;;  %v2565_v43 = vadd.f32 %v2497_v35, %v2290_v45  ;;  %3214 = vmatmul.msk.f32.gmra.mxu2 %vm237_vm0, %v3182_v2 }
 0x255   : > { %2760 = vst [vmem:[%s4450_s9 + $0x68] sm:$0xff] %v2728_v18  ;;  %3278 = vmatmul.msk.f32.gmra.mxu3 %vm237_vm0, %v3246_v46 }
 0x256   : > { %3342 = vmatmul.msk.f32.gmra.mxu0 %vm237_vm0, %v3310_v37  ;;  %v2600_v15 = vmul.f32 %v4424_v38, %v2565_v43 }
 0x257   : > { %v1950_v28 = vpop.f32.mrf.mxu2 }
 0x258   : > { %v2633_v27 = vadd.f32 %v4431_v49, %v2600_v15  ;;  %v2016_v60 = vadd.f32 %v1950_v28, %v1740_v24  ;;  %v2225_v11 = vpop.f32.mrf.mxu3  ;;  %v1677_v30 = vpop.f32.mrf.mxu1 }
 0x259   : > { %v1741_v10 = vadd.f32 %v1677_v30, %v4245_v12 }
 0x25a   : > { %vm2665_vm15 = vcmp.gt.f32.partialorder %v2633_v27, 0.0  ;;  %v2697_v32 = vmul.f32 0.1, %v2633_v27  ;;  %v2291_v63 = vadd.f32 %v2225_v11, %v2016_v60 }
 0x25b   : > { %v2503_v19 = vpop.f32.mrf.mxu0 }
 0x25c   : > { %v2729_v4 = vsel %vm2665_vm15, %v2633_v27, %v2697_v32  ;;  %v2566_v40 = vadd.f32 %v2500_v5, %v2291_v63 }
 0x25d   : > { %2761 = vst [vmem:[%s4450_s9 + $0x70] sm:$0xff] %v2729_v4 }
 0x25e   : > { %v2601_v44 = vmul.f32 %v4424_v38, %v2566_v40 }
 0x25f   : > { %v1953_v47 = vpop.f32.mrf.mxu2 }
 0x260   : > { %v2634_v53 = vadd.f32 %v4431_v49, %v2601_v44  ;;  %v2017_v17 = vadd.f32 %v1953_v47, %v1741_v10  ;;  %v2228_v54 = vpop.f32.mrf.mxu3  ;;  %v1680_v55 = vpop.f32.mrf.mxu1 }
 0x261   : > { %v1742_v57 = vadd.f32 %v1680_v55, %v4256_v8 }
 0x262   : > { %vm2666_vm0 = vcmp.gt.f32.partialorder %v2634_v53, 0.0  ;;  %v2698_v62 = vmul.f32 0.1, %v2634_v53  ;;  %v2292_v7 = vadd.f32 %v2228_v54, %v2017_v17 }
 0x263   : > { %v2506_v31 = vpop.f32.mrf.mxu0 }
 0x264   : > { %v2730_v36 = vsel %vm2666_vm0, %v2634_v53, %v2698_v62  ;;  %v2567_v56 = vadd.f32 %v2503_v19, %v2292_v7 }
 0x265   : > { %2762 = vst [vmem:[%s4450_s9 + $0x78] sm:$0xff] %v2730_v36 }
 0x266   : > { %v2602_v12 = vmul.f32 %v4424_v38, %v2567_v56 }
 0x267   : > { %v1956_v22 = vpop.f32.mrf.mxu2 }
 0x268   : > { %v2635_v21 = vadd.f32 %v4431_v49, %v2602_v12  ;;  %v2018_v35 = vadd.f32 %v1956_v22, %v1742_v57  ;;  %v2231_v23 = vpop.f32.mrf.mxu3  ;;  %v1683_v39 = vpop.f32.mrf.mxu1 }
 0x269   : > { %v1743_v50 = vadd.f32 %v1683_v39, %v4267_v34 }
 0x26a   : > { %vm2667_vm1 = vcmp.gt.f32.partialorder %v2635_v21, 0.0  ;;  %v2699_v41 = vmul.f32 0.1, %v2635_v21  ;;  %v2293_v0 = vadd.f32 %v2231_v23, %v2018_v35 }
 0x26b   : > { %v2509_v42 = vpop.f32.mrf.mxu0 }
 0x26c   : > { %v2731_v1 = vsel %vm2667_vm1, %v2635_v21, %v2699_v41  ;;  %v2568_v3 = vadd.f32 %v2506_v31, %v2293_v0 }
 0x26d   : > { %2763 = vst [vmem:[%s4450_s9 + $0x80] sm:$0xff] %v2731_v1 }
 0x26e   : > { %v2603_v8 = vmul.f32 %v4424_v38, %v2568_v3 }
 0x26f   : > { %v1959_v59 = vpop.f32.mrf.mxu2 }
 0x270   : > { %v2636_v48 = vadd.f32 %v4431_v49, %v2603_v8  ;;  %v2019_v2 = vadd.f32 %v1959_v59, %v1743_v50  ;;  %v2234_v14 = vpop.f32.mrf.mxu3  ;;  %v1686_v45 = vpop.f32.mrf.mxu1 }
 0x271   : > { %v1744_v24 = vadd.f32 %v1686_v45, %v4279_v58 }
 0x272   : > { %vm2668_vm2 = vcmp.gt.f32.partialorder %v2636_v48, 0.0  ;;  %v2700_v46 = vmul.f32 0.1, %v2636_v48  ;;  %v2294_v5 = vadd.f32 %v2234_v14, %v2019_v2 }
 0x273   : > { %v2512_v37 = vpop.f32.mrf.mxu0 }
 0x274   : > { %v2732_v18 = vsel %vm2668_vm2, %v2636_v48, %v2700_v46  ;;  %v2569_v43 = vadd.f32 %v2509_v42, %v2294_v5 }
 0x275   : > { %2764 = vst [vmem:[%s4450_s9 + $0x88] sm:$0xff] %v2732_v18 }
 0x276   : > { %v2604_v34 = vmul.f32 %v4424_v38, %v2569_v43 }
 0x277   : > { %v1962_v15 = vpop.f32.mrf.mxu2 }
 0x278   : > { %v2637_v28 = vadd.f32 %v4431_v49, %v2604_v34  ;;  %v2020_v27 = vadd.f32 %v1962_v15, %v1744_v24  ;;  %v2237_v60 = vpop.f32.mrf.mxu3  ;;  %v1689_v11 = vpop.f32.mrf.mxu1 }
 0x279   : > { %v1745_v40 = vadd.f32 %v1689_v11, %v4290_v29 }
 0x27a   : > { %vm2669_vm3 = vcmp.gt.f32.partialorder %v2637_v28, 0.0  ;;  %v2701_v30 = vmul.f32 0.1, %v2637_v28  ;;  %v2295_v32 = vadd.f32 %v2237_v60, %v2020_v27 }
 0x27b   : > { %v2515_v63 = vpop.f32.mrf.mxu0 }
 0x27c   : > { %v2733_v19 = vsel %vm2669_vm3, %v2637_v28, %v2701_v30  ;;  %v2570_v4 = vadd.f32 %v2512_v37, %v2295_v32 }
 0x27d   : > { %2765 = vst [vmem:[%s4450_s9 + $0x90] sm:$0xff] %v2733_v19 }
 0x27e   : > { %v2605_v58 = vmul.f32 %v4424_v38, %v2570_v4 }
 0x27f   : > { %v1965_v10 = vpop.f32.mrf.mxu2 }
 0x280   : > { %v2638_v44 = vadd.f32 %v4431_v49, %v2605_v58  ;;  %v2021_v47 = vadd.f32 %v1965_v10, %v1745_v40  ;;  %v2240_v53 = vpop.f32.mrf.mxu3  ;;  %v1692_v17 = vpop.f32.mrf.mxu1 }
 0x281   : > { %v1746_v36 = vadd.f32 %v1692_v17, %v4301_v13 }
 0x282   : > { %vm2670_vm4 = vcmp.gt.f32.partialorder %v2638_v44, 0.0  ;;  %v2702_v54 = vmul.f32 0.1, %v2638_v44  ;;  %v2296_v55 = vadd.f32 %v2240_v53, %v2021_v47 }
 0x283   : > { %v2518_v62 = vpop.f32.mrf.mxu0 }
 0x284   : > { %v2734_v7 = vsel %vm2670_vm4, %v2638_v44, %v2702_v54  ;;  %v2571_v31 = vadd.f32 %v2515_v63, %v2296_v55 }
 0x285   : > { %2766 = vst [vmem:[%s4450_s9 + $0x98] sm:$0xff] %v2734_v7 }
 0x286   : > { %v2606_v29 = vmul.f32 %v4424_v38, %v2571_v31 }
 0x287   : > { %v1968_v56 = vpop.f32.mrf.mxu2 }
 0x288   : > { %v2639_v57 = vadd.f32 %v4431_v49, %v2606_v29  ;;  %v2022_v12 = vadd.f32 %v1968_v56, %v1746_v36  ;;  %v2243_v22 = vpop.f32.mrf.mxu3  ;;  %v1695_v21 = vpop.f32.mrf.mxu1 }
 0x289   : > { %v1747_v42 = vadd.f32 %v1695_v21, %v4312_v51 }
 0x28a   : > { %vm2671_vm5 = vcmp.gt.f32.partialorder %v2639_v57, 0.0  ;;  %v2703_v35 = vmul.f32 0.1, %v2639_v57  ;;  %v2297_v23 = vadd.f32 %v2243_v22, %v2022_v12 }
 0x28b   : > { %v2521_v39 = vpop.f32.mrf.mxu0 }
 0x28c   : > { %v2735_v41 = vsel %vm2671_vm5, %v2639_v57, %v2703_v35  ;;  %v2572_v0 = vadd.f32 %v2518_v62, %v2297_v23 }
 0x28d   : > { %2767 = vst [vmem:[%s4450_s9 + $0xa0] sm:$0xff] %v2735_v41 }
 0x28e   : > { %v2607_v13 = vmul.f32 %v4424_v38, %v2572_v0 }
 0x28f   : > { %v1971_v1 = vpop.f32.mrf.mxu2 }
 0x290   : > { %v2640_v3 = vadd.f32 %v4431_v49, %v2607_v13  ;;  %v2023_v50 = vadd.f32 %v1971_v1, %v1747_v42  ;;  %v2246_v8 = vpop.f32.mrf.mxu3  ;;  %v1698_v59 = vpop.f32.mrf.mxu1 }
 0x291   : > { %v1748_v5 = vadd.f32 %v1698_v59, %v4323_v52 }
 0x292   : > { %vm2672_vm6 = vcmp.gt.f32.partialorder %v2640_v3, 0.0  ;;  %v2704_v48 = vmul.f32 0.1, %v2640_v3  ;;  %v2298_v2 = vadd.f32 %v2246_v8, %v2023_v50 }
 0x293   : > { %v2524_v14 = vpop.f32.mrf.mxu0 }
 0x294   : > { %v2736_v45 = vsel %vm2672_vm6, %v2640_v3, %v2704_v48  ;;  %v2573_v46 = vadd.f32 %v2521_v39, %v2298_v2 }
 0x295   : > { %2768 = vst [vmem:[%s4450_s9 + $0xa8] sm:$0xff] %v2736_v45 }
 0x296   : > { %v2608_v51 = vmul.f32 %v4424_v38, %v2573_v46 }
 0x297   : > { %v1974_v37 = vpop.f32.mrf.mxu2 }
 0x298   : > { %v2641_v18 = vadd.f32 %v4431_v49, %v2608_v51  ;;  %v2024_v43 = vadd.f32 %v1974_v37, %v1748_v5  ;;  %v2249_v24 = vpop.f32.mrf.mxu3  ;;  %v1701_v34 = vpop.f32.mrf.mxu1 }
 0x299   : > { %v1749_v30 = vadd.f32 %v1701_v34, %v4334_v6 }
 0x29a   : > { %vm2673_vm7 = vcmp.gt.f32.partialorder %v2641_v18, 0.0  ;;  %v2705_v15 = vmul.f32 0.1, %v2641_v18  ;;  %v2299_v28 = vadd.f32 %v2249_v24, %v2024_v43 }
 0x29b   : > { %v2527_v27 = vpop.f32.mrf.mxu0 }
 0x29c   : > { %v2737_v60 = vsel %vm2673_vm7, %v2641_v18, %v2705_v15  ;;  %v2574_v11 = vadd.f32 %v2524_v14, %v2299_v28 }
 0x29d   : > { %2769 = vst [vmem:[%s4450_s9 + $0xb0] sm:$0xff] %v2737_v60 }
 0x29e   : > { %v2609_v52 = vmul.f32 %v4424_v38, %v2574_v11 }
 0x29f   : > { %v1977_v32 = vpop.f32.mrf.mxu2 }
 0x2a0   : > { %v2642_v63 = vadd.f32 %v4431_v49, %v2609_v52  ;;  %v2025_v19 = vadd.f32 %v1977_v32, %v1749_v30  ;;  %v2252_v4 = vpop.f32.mrf.mxu3  ;;  %v1704_v40 = vpop.f32.mrf.mxu1 }
 0x2a1   : > { %v1750_v17 = vadd.f32 %v1704_v40, %v4345_v16 }
 0x2a2   : > { %vm2674_vm8 = vcmp.gt.f32.partialorder %v2642_v63, 0.0  ;;  %v2706_v58 = vmul.f32 0.1, %v2642_v63  ;;  %v2300_v10 = vadd.f32 %v2252_v4, %v2025_v19 }
 0x2a3   : > { %v2530_v44 = vpop.f32.mrf.mxu0 }
 0x2a4   : > { %v2738_v47 = vsel %vm2674_vm8, %v2642_v63, %v2706_v58  ;;  %v2575_v53 = vadd.f32 %v2527_v27, %v2300_v10 }
 0x2a5   : > { %2770 = vst [vmem:[%s4450_s9 + $0xb8] sm:$0xff] %v2738_v47 }
 0x2a6   : > { %v2610_v6 = vmul.f32 %v4424_v38, %v2575_v53 }
 0x2a7   : > { %v1980_v54 = vpop.f32.mrf.mxu2 }
 0x2a8   : > { %v2643_v55 = vadd.f32 %v4431_v49, %v2610_v6  ;;  %v2026_v62 = vadd.f32 %v1980_v54, %v1750_v17  ;;  %v2255_v7 = vpop.f32.mrf.mxu3  ;;  %v1707_v31 = vpop.f32.mrf.mxu1 }
 0x2a9   : > { %v1751_v22 = vadd.f32 %v1707_v31, %v4356_v33 }
 0x2aa   : > { %vm2675_vm9 = vcmp.gt.f32.partialorder %v2643_v55, 0.0  ;;  %v2707_v36 = vmul.f32 0.1, %v2643_v55  ;;  %v2301_v29 = vadd.f32 %v2255_v7, %v2026_v62 }
 0x2ab   : > { %v2533_v56 = vpop.f32.mrf.mxu0 }
 0x2ac   : > { %v2739_v57 = vsel %vm2675_vm9, %v2643_v55, %v2707_v36  ;;  %v2576_v12 = vadd.f32 %v2530_v44, %v2301_v29 }
 0x2ad   : > { %2771 = vst [vmem:[%s4450_s9 + $0xc0] sm:$0xff] %v2739_v57 }
 0x2ae   : > { %v2611_v16 = vmul.f32 %v4424_v38, %v2576_v12 }
 0x2af   : > { %v1983_v21 = vpop.f32.mrf.mxu2 }
 0x2b0   : > { %v2644_v35 = vadd.f32 %v4431_v49, %v2611_v16  ;;  %v2027_v23 = vadd.f32 %v1983_v21, %v1751_v22  ;;  %v2258_v39 = vpop.f32.mrf.mxu3  ;;  %v1710_v41 = vpop.f32.mrf.mxu1 }
 0x2b1   : > { %v1752_v50 = vadd.f32 %v1710_v41, %v4367_v20 }
 0x2b2   : > { %vm2676_vm10 = vcmp.gt.f32.partialorder %v2644_v35, 0.0  ;;  %v2708_v0 = vmul.f32 0.1, %v2644_v35  ;;  %v2302_v42 = vadd.f32 %v2258_v39, %v2027_v23 }
 0x2b3   : > { %v2536_v13 = vpop.f32.mrf.mxu0 }
 0x2b4   : > { %v2740_v1 = vsel %vm2676_vm10, %v2644_v35, %v2708_v0  ;;  %v2577_v3 = vadd.f32 %v2533_v56, %v2302_v42 }
 0x2b5   : > { %2772 = vst [vmem:[%s4450_s9 + $0xc8] sm:$0xff] %v2740_v1 }
 0x2b6   : > { %v2612_v33 = vmul.f32 %v4424_v38, %v2577_v3 }
 0x2b7   : > { %v1986_v8 = vpop.f32.mrf.mxu2 }
 0x2b8   : > { %v2645_v59 = vadd.f32 %v4431_v49, %v2612_v33  ;;  %v2028_v48 = vadd.f32 %v1986_v8, %v1752_v50  ;;  %v2261_v2 = vpop.f32.mrf.mxu3  ;;  %v1713_v14 = vpop.f32.mrf.mxu1 }
 0x2b9   : > { %v1753_v18 = vadd.f32 %v1713_v14, %v4378_v61 }
 0x2ba   : > { %vm2677_vm11 = vcmp.gt.f32.partialorder %v2645_v59, 0.0  ;;  %v2709_v45 = vmul.f32 0.1, %v2645_v59  ;;  %v2303_v46 = vadd.f32 %v2261_v2, %v2028_v48 }
 0x2bb   : > { %v2539_v5 = vpop.f32.mrf.mxu0 }
 0x2bc   : > { %v2741_v51 = vsel %vm2677_vm11, %v2645_v59, %v2709_v45  ;;  %v2578_v37 = vadd.f32 %v2536_v13, %v2303_v46 }
 0x2bd   : > { %2773 = vst [vmem:[%s4450_s9 + $0xd0] sm:$0xff] %v2741_v51 }
 0x2be   : > { %v2613_v20 = vmul.f32 %v4424_v38, %v2578_v37 }
 0x2bf   : > { %v1989_v43 = vpop.f32.mrf.mxu2 }
 0x2c0   : > { %v2646_v24 = vadd.f32 %v4431_v49, %v2613_v20  ;;  %v2029_v34 = vadd.f32 %v1989_v43, %v1753_v18  ;;  %v2264_v15 = vpop.f32.mrf.mxu3  ;;  %v1716_v28 = vpop.f32.mrf.mxu1 }
 0x2c1   : > { %v1754_v32 = vadd.f32 %v1716_v28, %v4389_v25  ;;  %v3399_v25 = vld [vmem:[%s4712_s2] ss:$0 sm:$0xff] }
 0x2c2   : > { %vm2678_vm12 = vcmp.gt.f32.partialorder %v2646_v24, 0.0  ;;  %v2710_v27 = vmul.f32 0.1, %v2646_v24  ;;  %v2304_v60 = vadd.f32 %v2264_v15, %v2029_v34 }
 0x2c3   : > { %v2542_v52 = vpop.f32.mrf.mxu0 }
 0x2c4   : > { %v2742_v11 = vsel %vm2678_vm12, %v2646_v24, %v2710_v27  ;;  %v2579_v30 = vadd.f32 %v2539_v5, %v2304_v60 }
 0x2c5   : > { %2774 = vst [vmem:[%s4450_s9 + $0xd8] sm:$0xff] %v2742_v11 }
 0x2c6   : > { %v2614_v61 = vmul.f32 %v4424_v38, %v2579_v30 }
 0x2c7   : > { %v1992_v63 = vpop.f32.mrf.mxu2 }
 0x2c8   : > { %v2647_v19 = vadd.f32 %v4431_v49, %v2614_v61  ;;  %v2030_v4 = vadd.f32 %v1992_v63, %v1754_v32  ;;  %v2267_v40 = vpop.f32.mrf.mxu3  ;;  %v1719_v58 = vpop.f32.mrf.mxu1 }
 0x2c9   : > { %v1755_v17 = vadd.f32 %v1719_v58, %v4400_v26 }
 0x2ca   : > { %vm2679_vm13 = vcmp.gt.f32.partialorder %v2647_v19, 0.0  ;;  %v2711_v10 = vmul.f32 0.1, %v2647_v19  ;;  %v2305_v44 = vadd.f32 %v2267_v40, %v2030_v4 }
 0x2cb   : > { %v2545_v54 = vpop.f32.mrf.mxu0 }
 0x2cc   : > { %v2743_v47 = vsel %vm2679_vm13, %v2647_v19, %v2711_v10  ;;  %v2580_v53 = vadd.f32 %v2542_v52, %v2305_v44 }
 0x2cd   : > { %2775 = vst [vmem:[%s4450_s9 + $0xe0] sm:$0xff] %v2743_v47 }
 0x2ce   : > { %v2615_v38 = vmul.f32 %v3399_v25, %v2580_v53 }
 0x2cf   : > { %v1995_v6 = vpop.f32.mrf.mxu2 }
 0x2d0   : > { %v2648_v55 = vadd.f32 %v4431_v49, %v2615_v38  ;;  %v2031_v62 = vadd.f32 %v1995_v6, %v1755_v17  ;;  %v2270_v7 = vpop.f32.mrf.mxu3  ;;  %v1722_v29 = vpop.f32.mrf.mxu1  ;;  %v3400_v49 = vld [vmem:[%s4712_s2 + $0x1] ss:$0 sm:$0xff] }
 0x2d1   : > { %v1756_v26 = vadd.f32 %v1722_v29, %v4411_v9 }
 0x2d2   : > { %vm2680_vm14 = vcmp.gt.f32.partialorder %v2648_v55, 0.0  ;;  %v2712_v31 = vmul.f32 0.1, %v2648_v55  ;;  %v2306_v36 = vadd.f32 %v2270_v7, %v2031_v62 }
 0x2d3   : > { %v2548_v23 = vpop.f32.mrf.mxu0 }
 0x2d4   : > { %v2744_v56 = vsel %vm2680_vm14, %v2648_v55, %v2712_v31  ;;  %v2581_v57 = vadd.f32 %v2545_v54, %v2306_v36 }
 0x2d5   : > { %2776 = vst [vmem:[%s4450_s9 + $0xe8] sm:$0xff] %v2744_v56 }
 0x2d6   : > { %v2616_v12 = vmul.f32 %v3399_v25, %v2581_v57 }
 0x2d7   : > { %v1998_v22 = vpop.f32.mrf.mxu2 }
 0x2d8   : > { %v2649_v16 = vadd.f32 %v3400_v49, %v2616_v12  ;;  %v2032_v21 = vadd.f32 %v1998_v22, %v1756_v26  ;;  %v2273_v35 = vpop.f32.mrf.mxu3 }
 0x2da   : > { %vm2681_vm15 = vcmp.gt.f32.partialorder %v2649_v16, 0.0  ;;  %v2713_v39 = vmul.f32 0.1, %v2649_v16  ;;  %v2307_v41 = vadd.f32 %v2273_v35, %v2032_v21 }
 0x2dc   : > { %v2745_v0 = vsel %vm2681_vm15, %v2649_v16, %v2713_v39  ;;  %v2582_v42 = vadd.f32 %v2548_v23, %v2307_v41 }
 0x2dd   : > { %2777 = vst [vmem:[%s4450_s9 + $0xf0] sm:$0xff] %v2745_v0 }
 0x2de   : > { %v2617_v9 = vmul.f32 %v3399_v25, %v2582_v42 }
 0x2e0   : > { %v2650_v13 = vadd.f32 %v3400_v49, %v2617_v9 }
 0x2e2   : > { %vm2682_vm0 = vcmp.gt.f32.partialorder %v2650_v13, 0.0  ;;  %v2714_v1 = vmul.f32 0.1, %v2650_v13 }
 0x2e4   : > { %v2746_v3 = vsel %vm2682_vm0, %v2650_v13, %v2714_v1 }
 0x2e5   : > { %2778 = vst [vmem:[%s4450_s9 + $0xf8] sm:$0xff] %v2746_v3 }
 0x2e6   : > { %3428 = shalt.err (!%p3425_p3)
}
 0x2e7   : > { %s3465_s5 = smov 128   ;;  %s3466_s9 = smov 8  }
 0x2e8   : > { %3356 = dma.vmem_to_hbm [thread:$0]  (%p3525_p5), %s2793_s27, 4096, %s2795_s28, %s2780_s16, %s3465_s5, %s3465_s5, %s3466_s9  }
 0x2e9 PF: > { %p3362_p4 = scmp.ge.s32.totalorder %s3463_s15, 2  ;;  %s2809_s10 = sand.u32 1, %s3451_s12  }
 0x2ea   : > { %s2810_s11 = scalar_lea.sflag [#allocation3], %s2809_s10 }
 0x2eb   : > { %p3359_p7 = pnand %p3362_p4, %p3529_p6 }
 0x2ed   : > { %p3360_p8 = pneg %p3359_p7 }
 0x2ef   : > { %3446 = dma.done.wait (%p3360_p8), %s2810_s11, 4096  }
 0x2f0   : > { %3448 = vsyncadd (%p3360_p8), %s2810_s11, 4294963200  ;;  %p13_p9 = scmp.ge.s32.totalorder %s3512_s18, 4   ;;  %s4812_s12 = smov %s3455_s13 }
 0x2f1   : > { %s4813_s13 = smov %s3459_s14  ;;  %s4814_s14 = smov %s3523_s21 }
 0x2f2   : > { %s4815_s15 = smov %s3512_s18  ;;  %15 = sbr.rel (!%p13_p9) target bundleno = 3 (0x3), region = 69 }
 0x2f7   :  { %2816 = vsyncpa [#allocation3], 1 }
 0x2f8   :  { %2818 = vsyncpa [#allocation3 + $0x1], 1 }

</bundles_post_ra>
